<compile_context>
chip_gen: v6e
topology: v6e:2x2x1
jax: 0.10.0
libtpu: 0.0.40
codegen_flags: <defaults>
</compile_context>

<pallas_src>
import jax
import jax.numpy as jnp
from jax.experimental import pallas as pl
from jax.experimental.pallas import tpu as pltpu


def edge_conv2d_pallas(x, edge_index, w_dense, bias):
    """x: (B, C, N, 1) f32, edge_index: (2, B, N, K) int32,
    w_dense: (2C, O) dense (block-diagonal) embedding of the grouped 1x1 conv weight,
    bias: (O,). Returns (B, O, N, 1) f32."""
    B, C, N, _ = x.shape
    K = edge_index.shape[-1]
    O = w_dense.shape[1]

    # ---- tiling / padding (lane-dense vertices, bf16-friendly channel pads) ----
    TN = min(512, 128 * ((N + 127) // 128))            # vertex tile (lane dim)
    N_pad = TN * ((N + TN - 1) // TN)
    NT = N_pad // TN
    C_pad = ((C + 15) // 16) * 16
    O_pad = ((O + 15) // 16) * 16

    # ---- glue: layout plumbing only (no activation-sized transposes) ----
    # features stay channel-major: (B, C, N) -> padded bf16
    xp = jnp.pad(x[..., 0], ((0, 0), (0, C_pad - C), (0, N_pad - N))).astype(jnp.bfloat16)
    # edge indices: (2, B, K, N) with N lane-dense
    e = jnp.transpose(edge_index, (0, 1, 3, 2)).astype(jnp.int32)
    e = jnp.pad(e, ((0, 0), (0, 0), (0, 0), (0, N_pad - N)))
    # transposed weights so the 1x1 conv is W^T @ X (channels on sublanes)
    w_a = w_dense[:C, :]
    w_b = w_dense[C:, :]
    wt_d = jnp.pad((w_a - w_b).T, ((0, O_pad - O), (0, C_pad - C))).astype(jnp.bfloat16)
    wt_b = jnp.pad(w_b.T, ((0, O_pad - O), (0, C_pad - C))).astype(jnp.bfloat16)
    b2 = jnp.pad(bias, (0, O_pad - O)).astype(jnp.float32).reshape(O_pad, 1)

    def kernel(idx_ref, x_ref, wd_ref, wb_ref, b_ref, o_ref):
        # idx_ref: (2, 1, K, TN) i32 | x_ref: (1, C_pad, N_pad) bf16
        # wd_ref/wb_ref: (O_pad, C_pad) bf16 | b_ref: (O_pad, 1) f32
        # o_ref: (1, O_pad, TN) f32
        xb = x_ref[0]                                                    # (C_pad, N_pad)
        idx = idx_ref[...]                                               # (2, 1, K, TN)
        vert = jax.lax.broadcasted_iota(jnp.int32, (N_pad, TN), 0)       # source-vertex id

        def gather(sel):
            # sel: (1, TN) vertex ids -> gathered raw features (C_pad, TN).
            # One-hot is exact in bf16; exactly one nonzero per column, so the f32
            # accumulation reproduces the bf16 feature values exactly.
            oh = (vert == sel).astype(jnp.bfloat16)                      # (N_pad, TN)
            return jnp.dot(xb, oh, preferred_element_type=jnp.float32)   # (C_pad, TN)

        # center term: edge_index[1] is constant across K in ViG -> gather once (k=0)
        x_i = gather(idx[1, 0, 0:1, :]).astype(jnp.bfloat16)             # exact cast
        a = jnp.dot(wd_ref[...], x_i, preferred_element_type=jnp.float32) + b_ref[...]

        # neighbor term: running max over K of Wb^T x_{j_k}
        def nbr(k):
            x_j = gather(idx[0, 0, k:k + 1, :]).astype(jnp.bfloat16)     # exact cast
            return jnp.dot(wb_ref[...], x_j, preferred_element_type=jnp.float32)

        m = nbr(0)
        for k in range(1, K):                                            # unrolled VPU max
            m = jnp.maximum(m, nbr(k))

        # max_k ReLU(a + s_k) == ReLU(a + max_k s_k)   (ReLU is monotone)
        o_ref[0] = jnp.maximum(a + m, 0.0).astype(o_ref.dtype)

    out = pl.pallas_call(
        kernel,
        out_shape=jax.ShapeDtypeStruct((B, O_pad, N_pad), jnp.float32),
        grid_spec=pltpu.PrefetchScalarGridSpec(
            num_scalar_prefetch=0,
            grid=(B, NT),
            in_specs=[
                pl.BlockSpec((2, 1, K, TN), lambda b, nt: (0, b, 0, nt)),      # edge indices
                pl.BlockSpec((1, C_pad, N_pad), lambda b, nt: (b, 0, 0)),      # features
                pl.BlockSpec((O_pad, C_pad), lambda b, nt: (0, 0)),            # (Wa-Wb)^T
                pl.BlockSpec((O_pad, C_pad), lambda b, nt: (0, 0)),            # Wb^T
                pl.BlockSpec((O_pad, 1), lambda b, nt: (0, 0)),                # bias
            ],
            out_specs=pl.BlockSpec((1, O_pad, TN), lambda b, nt: (b, 0, nt)),
        ),
        compiler_params=pltpu.CompilerParams(
            dimension_semantics=("parallel", "parallel"),
            vmem_limit_bytes=64 * 1024 * 1024,
        ),
    )(e, xp, wt_d, wt_b, b2)

    # strip padding; layout is already (B, O, N) channel-major -> just add trailing dim
    return out[:, :O, :N][..., None]


def reference_edgeconv(x, edge_index, w_conv, bias, groups):
    """Pure-JAX f32 reference mirroring the PyTorch module (grouped 1x1 conv)."""
    B, C, N, _ = x.shape
    xv = x[..., 0]                                                      # (B, C, N)

    def gather(idx):                                                    # idx: (B, N, K)
        K = idx.shape[-1]
        flat = idx.reshape(B, 1, N * K)
        g = jnp.take_along_axis(xv, jnp.broadcast_to(flat, (B, C, N * K)), axis=2)
        return g.reshape(B, C, N, K)

    x_i = gather(edge_index[1])
    x_j = gather(edge_index[0])
    feat = jnp.concatenate([x_i, x_j - x_i], axis=1)                    # (B, 2C, N, K)
    out = jax.lax.conv_general_dilated(
        feat, w_conv, window_strides=(1, 1), padding='VALID',
        dimension_numbers=('NCHW', 'OIHW', 'NCHW'),
        feature_group_count=groups)
    out = jax.nn.relu(out + bias[None, :, None, None])
    return jnp.max(out, axis=-1, keepdims=True)                         # (B, O, N, 1)


if __name__ == "__main__":
    # small shapes: batch=2, in_channels=4, out_channels=8, vertices N=16, K=8 neighbors
    B, C, O, N, K, G = 2, 4, 8, 16, 8, 4   # G=4: groups of ViG BasicConv's Conv2d

    key = jax.random.PRNGKey(0)
    kx, kn, kw, kb = jax.random.split(key, 4)
    x = jax.random.normal(kx, (B, C, N, 1), dtype=jnp.float32)
    idx_nbr = jax.random.randint(kn, (B, N, K), 0, N)                    # edge_index[0]
    idx_ctr = jnp.broadcast_to(jnp.arange(N)[None, :, None], (B, N, K))  # edge_index[1]
    edge_index = jnp.stack([idx_nbr, idx_ctr]).astype(jnp.int32)         # (2, B, N, K)

    # deterministic parameter init (Conv2d(2C, O, 1, groups=G, bias=True))
    Cg, Og = (2 * C) // G, O // G
    w_conv = jax.random.normal(kw, (O, Cg, 1, 1), dtype=jnp.float32) * 0.3
    bias = jax.random.normal(kb, (O,), dtype=jnp.float32) * 0.1

    # dense block-diagonal embedding of the grouped conv weight
    w_dense = jnp.zeros((2 * C, O), dtype=jnp.float32)
    for g in range(G):
        blk = w_conv[g * Og:(g + 1) * Og, :, 0, 0]                      # (Og, Cg)
        w_dense = w_dense.at[g * Cg:(g + 1) * Cg, g * Og:(g + 1) * Og].set(blk.T)

    out = jax.block_until_ready(edge_conv2d_pallas(x, edge_index, w_dense, bias))
    ref = reference_edgeconv(x, edge_index, w_conv, bias, G)

    assert out.shape == (B, O, N, 1), out.shape
    # tolerance accounts for bf16 matmul inputs (f32 accumulation); the gather is exact
    assert jnp.allclose(out, ref, atol=5e-2, rtol=5e-2), float(jnp.max(jnp.abs(out - ref)))
    print("KERNEL_OK")
</pallas_src>

<mosaic_0001>
module attributes {stable_mosaic.version = 11 : i64} {
  func.func @kernel(%arg0: i32, %arg1: i32, %arg2: memref<2x1x8x128xi32, #tpu.memory_space<vmem>>, %arg3: memref<1x16x128xbf16, #tpu.memory_space<vmem>>, %arg4: memref<16x16xbf16, #tpu.memory_space<vmem>>, %arg5: memref<16x16xbf16, #tpu.memory_space<vmem>>, %arg6: memref<16x1xf32, #tpu.memory_space<vmem>>, %arg7: memref<1x16x128xf32, #tpu.memory_space<vmem>>) attributes {dimension_semantics = [#tpu.dimension_semantics<parallel>, #tpu.dimension_semantics<parallel>], iteration_bounds = array<i64: 2, 1>, scalar_prefetch = 0 : i64, scratch_operands = 0 : i64, tpu.core_type = #tpu.core_type<tc>, window_params = [{transform_indices = @transform_0, window_bounds = array<i64: 2, 1, 8, 128>}, {transform_indices = @transform_1, window_bounds = array<i64: 1, 16, 128>}, {pipeline_mode = #tpu.pipeline_mode<synchronous>, transform_indices = @transform_2, window_bounds = array<i64: 16, 16>}, {pipeline_mode = #tpu.pipeline_mode<synchronous>, transform_indices = @transform_3, window_bounds = array<i64: 16, 16>}, {pipeline_mode = #tpu.pipeline_mode<synchronous>, transform_indices = @transform_4, window_bounds = array<i64: 16, 1>}, {transform_indices = @transform_5, window_bounds = array<i64: 1, 16, 128>}]} {
    %c0 = arith.constant 0 : index
    %c0_0 = arith.constant 0 : index
    %c0_1 = arith.constant 0 : index
    %0 = vector.load %arg3[%c0, %c0_0, %c0_1] : memref<1x16x128xbf16, #tpu.memory_space<vmem>>, vector<1x16x128xbf16>
    %1 = vector.shape_cast %0 : vector<1x16x128xbf16> to vector<16x128xbf16>
    %c0_2 = arith.constant 0 : index
    %c0_3 = arith.constant 0 : index
    %c0_4 = arith.constant 0 : index
    %c0_5 = arith.constant 0 : index
    %2 = vector.load %arg2[%c0_2, %c0_3, %c0_4, %c0_5] : memref<2x1x8x128xi32, #tpu.memory_space<vmem>>, vector<2x1x8x128xi32>
    %3 = tpu.iota {dimensions = array<i32: 0>} : vector<128x128xi32>
    %4 = vector.extract_strided_slice %2 {offsets = [1, 0, 0, 0], sizes = [1, 1, 1, 128], strides = [1, 1, 1, 1]} : vector<2x1x8x128xi32> to vector<1x1x1x128xi32>
    %5 = vector.shape_cast %4 : vector<1x1x1x128xi32> to vector<1x128xi32>
    %6 = vector.broadcast %5 : vector<1x128xi32> to vector<128x128xi32>
    %7 = arith.cmpi eq, %3, %6 : vector<128x128xi32>
    %8 = arith.extui %7 : vector<128x128xi1> to vector<128x128xi32>
    %9 = arith.sitofp %8 : vector<128x128xi32> to vector<128x128xf32>
    %10 = arith.truncf %9 : vector<128x128xf32> to vector<128x128xbf16>
    %cst = arith.constant dense<0.000000e+00> : vector<16x128xf32>
    %11 = tpu.matmul %1, %10, %cst {dimension_numbers = #tpu.dot_dimension_numbers<[1], [0], [0], [1], [0, 0, 1, 1], [], []>} : vector<16x128xbf16>, vector<128x128xbf16>, vector<16x128xf32> -> vector<16x128xf32>
    %12 = arith.truncf %11 : vector<16x128xf32> to vector<16x128xbf16>
    %c0_6 = arith.constant 0 : index
    %c0_7 = arith.constant 0 : index
    %13 = vector.load %arg4[%c0_6, %c0_7] : memref<16x16xbf16, #tpu.memory_space<vmem>>, vector<16x16xbf16>
    %cst_8 = arith.constant dense<0.000000e+00> : vector<16x128xf32>
    %14 = tpu.matmul %13, %12, %cst_8 {dimension_numbers = #tpu.dot_dimension_numbers<[1], [0], [0], [1], [0, 0, 1, 1], [], []>} : vector<16x16xbf16>, vector<16x128xbf16>, vector<16x128xf32> -> vector<16x128xf32>
    %c0_9 = arith.constant 0 : index
    %c0_10 = arith.constant 0 : index
    %15 = vector.load %arg6[%c0_9, %c0_10] : memref<16x1xf32, #tpu.memory_space<vmem>>, vector<16x1xf32>
    %16 = vector.broadcast %15 : vector<16x1xf32> to vector<16x128xf32>
    %17 = arith.addf %14, %16 : vector<16x128xf32>
    %18 = vector.extract_strided_slice %2 {offsets = [0, 0, 0, 0], sizes = [1, 1, 1, 128], strides = [1, 1, 1, 1]} : vector<2x1x8x128xi32> to vector<1x1x1x128xi32>
    %19 = vector.shape_cast %18 : vector<1x1x1x128xi32> to vector<1x128xi32>
    %20 = vector.broadcast %19 : vector<1x128xi32> to vector<128x128xi32>
    %21 = arith.cmpi eq, %3, %20 : vector<128x128xi32>
    %22 = arith.extui %21 : vector<128x128xi1> to vector<128x128xi32>
    %23 = arith.sitofp %22 : vector<128x128xi32> to vector<128x128xf32>
    %24 = arith.truncf %23 : vector<128x128xf32> to vector<128x128xbf16>
    %cst_11 = arith.constant dense<0.000000e+00> : vector<16x128xf32>
    %25 = tpu.matmul %1, %24, %cst_11 {dimension_numbers = #tpu.dot_dimension_numbers<[1], [0], [0], [1], [0, 0, 1, 1], [], []>} : vector<16x128xbf16>, vector<128x128xbf16>, vector<16x128xf32> -> vector<16x128xf32>
    %26 = arith.truncf %25 : vector<16x128xf32> to vector<16x128xbf16>
    %c0_12 = arith.constant 0 : index
    %c0_13 = arith.constant 0 : index
    %27 = vector.load %arg5[%c0_12, %c0_13] : memref<16x16xbf16, #tpu.memory_space<vmem>>, vector<16x16xbf16>
    %cst_14 = arith.constant dense<0.000000e+00> : vector<16x128xf32>
    %28 = tpu.matmul %27, %26, %cst_14 {dimension_numbers = #tpu.dot_dimension_numbers<[1], [0], [0], [1], [0, 0, 1, 1], [], []>} : vector<16x16xbf16>, vector<16x128xbf16>, vector<16x128xf32> -> vector<16x128xf32>
    %29 = vector.extract_strided_slice %2 {offsets = [0, 0, 1, 0], sizes = [1, 1, 1, 128], strides = [1, 1, 1, 1]} : vector<2x1x8x128xi32> to vector<1x1x1x128xi32>
    %30 = vector.shape_cast %29 : vector<1x1x1x128xi32> to vector<1x128xi32>
    %31 = vector.broadcast %30 : vector<1x128xi32> to vector<128x128xi32>
    %32 = arith.cmpi eq, %3, %31 : vector<128x128xi32>
    %33 = arith.extui %32 : vector<128x128xi1> to vector<128x128xi32>
    %34 = arith.sitofp %33 : vector<128x128xi32> to vector<128x128xf32>
    %35 = arith.truncf %34 : vector<128x128xf32> to vector<128x128xbf16>
    %cst_15 = arith.constant dense<0.000000e+00> : vector<16x128xf32>
    %36 = tpu.matmul %1, %35, %cst_15 {dimension_numbers = #tpu.dot_dimension_numbers<[1], [0], [0], [1], [0, 0, 1, 1], [], []>} : vector<16x128xbf16>, vector<128x128xbf16>, vector<16x128xf32> -> vector<16x128xf32>
    %37 = arith.truncf %36 : vector<16x128xf32> to vector<16x128xbf16>
    %c0_16 = arith.constant 0 : index
    %c0_17 = arith.constant 0 : index
    %38 = vector.load %arg5[%c0_16, %c0_17] : memref<16x16xbf16, #tpu.memory_space<vmem>>, vector<16x16xbf16>
    %cst_18 = arith.constant dense<0.000000e+00> : vector<16x128xf32>
    %39 = tpu.matmul %38, %37, %cst_18 {dimension_numbers = #tpu.dot_dimension_numbers<[1], [0], [0], [1], [0, 0, 1, 1], [], []>} : vector<16x16xbf16>, vector<16x128xbf16>, vector<16x128xf32> -> vector<16x128xf32>
    %40 = arith.maximumf %28, %39 : vector<16x128xf32>
    %41 = vector.extract_strided_slice %2 {offsets = [0, 0, 2, 0], sizes = [1, 1, 1, 128], strides = [1, 1, 1, 1]} : vector<2x1x8x128xi32> to vector<1x1x1x128xi32>
    %42 = vector.shape_cast %41 : vector<1x1x1x128xi32> to vector<1x128xi32>
    %43 = vector.broadcast %42 : vector<1x128xi32> to vector<128x128xi32>
    %44 = arith.cmpi eq, %3, %43 : vector<128x128xi32>
    %45 = arith.extui %44 : vector<128x128xi1> to vector<128x128xi32>
    %46 = arith.sitofp %45 : vector<128x128xi32> to vector<128x128xf32>
    %47 = arith.truncf %46 : vector<128x128xf32> to vector<128x128xbf16>
    %cst_19 = arith.constant dense<0.000000e+00> : vector<16x128xf32>
    %48 = tpu.matmul %1, %47, %cst_19 {dimension_numbers = #tpu.dot_dimension_numbers<[1], [0], [0], [1], [0, 0, 1, 1], [], []>} : vector<16x128xbf16>, vector<128x128xbf16>, vector<16x128xf32> -> vector<16x128xf32>
    %49 = arith.truncf %48 : vector<16x128xf32> to vector<16x128xbf16>
    %c0_20 = arith.constant 0 : index
    %c0_21 = arith.constant 0 : index
    %50 = vector.load %arg5[%c0_20, %c0_21] : memref<16x16xbf16, #tpu.memory_space<vmem>>, vector<16x16xbf16>
    %cst_22 = arith.constant dense<0.000000e+00> : vector<16x128xf32>
    %51 = tpu.matmul %50, %49, %cst_22 {dimension_numbers = #tpu.dot_dimension_numbers<[1], [0], [0], [1], [0, 0, 1, 1], [], []>} : vector<16x16xbf16>, vector<16x128xbf16>, vector<16x128xf32> -> vector<16x128xf32>
    %52 = arith.maximumf %40, %51 : vector<16x128xf32>
    %53 = vector.extract_strided_slice %2 {offsets = [0, 0, 3, 0], sizes = [1, 1, 1, 128], strides = [1, 1, 1, 1]} : vector<2x1x8x128xi32> to vector<1x1x1x128xi32>
    %54 = vector.shape_cast %53 : vector<1x1x1x128xi32> to vector<1x128xi32>
    %55 = vector.broadcast %54 : vector<1x128xi32> to vector<128x128xi32>
    %56 = arith.cmpi eq, %3, %55 : vector<128x128xi32>
    %57 = arith.extui %56 : vector<128x128xi1> to vector<128x128xi32>
    %58 = arith.sitofp %57 : vector<128x128xi32> to vector<128x128xf32>
    %59 = arith.truncf %58 : vector<128x128xf32> to vector<128x128xbf16>
    %cst_23 = arith.constant dense<0.000000e+00> : vector<16x128xf32>
    %60 = tpu.matmul %1, %59, %cst_23 {dimension_numbers = #tpu.dot_dimension_numbers<[1], [0], [0], [1], [0, 0, 1, 1], [], []>} : vector<16x128xbf16>, vector<128x128xbf16>, vector<16x128xf32> -> vector<16x128xf32>
    %61 = arith.truncf %60 : vector<16x128xf32> to vector<16x128xbf16>
    %c0_24 = arith.constant 0 : index
    %c0_25 = arith.constant 0 : index
    %62 = vector.load %arg5[%c0_24, %c0_25] : memref<16x16xbf16, #tpu.memory_space<vmem>>, vector<16x16xbf16>
    %cst_26 = arith.constant dense<0.000000e+00> : vector<16x128xf32>
    %63 = tpu.matmul %62, %61, %cst_26 {dimension_numbers = #tpu.dot_dimension_numbers<[1], [0], [0], [1], [0, 0, 1, 1], [], []>} : vector<16x16xbf16>, vector<16x128xbf16>, vector<16x128xf32> -> vector<16x128xf32>
    %64 = arith.maximumf %52, %63 : vector<16x128xf32>
    %65 = vector.extract_strided_slice %2 {offsets = [0, 0, 4, 0], sizes = [1, 1, 1, 128], strides = [1, 1, 1, 1]} : vector<2x1x8x128xi32> to vector<1x1x1x128xi32>
    %66 = vector.shape_cast %65 : vector<1x1x1x128xi32> to vector<1x128xi32>
    %67 = vector.broadcast %66 : vector<1x128xi32> to vector<128x128xi32>
    %68 = arith.cmpi eq, %3, %67 : vector<128x128xi32>
    %69 = arith.extui %68 : vector<128x128xi1> to vector<128x128xi32>
    %70 = arith.sitofp %69 : vector<128x128xi32> to vector<128x128xf32>
    %71 = arith.truncf %70 : vector<128x128xf32> to vector<128x128xbf16>
    %cst_27 = arith.constant dense<0.000000e+00> : vector<16x128xf32>
    %72 = tpu.matmul %1, %71, %cst_27 {dimension_numbers = #tpu.dot_dimension_numbers<[1], [0], [0], [1], [0, 0, 1, 1], [], []>} : vector<16x128xbf16>, vector<128x128xbf16>, vector<16x128xf32> -> vector<16x128xf32>
    %73 = arith.truncf %72 : vector<16x128xf32> to vector<16x128xbf16>
    %c0_28 = arith.constant 0 : index
    %c0_29 = arith.constant 0 : index
    %74 = vector.load %arg5[%c0_28, %c0_29] : memref<16x16xbf16, #tpu.memory_space<vmem>>, vector<16x16xbf16>
    %cst_30 = arith.constant dense<0.000000e+00> : vector<16x128xf32>
    %75 = tpu.matmul %74, %73, %cst_30 {dimension_numbers = #tpu.dot_dimension_numbers<[1], [0], [0], [1], [0, 0, 1, 1], [], []>} : vector<16x16xbf16>, vector<16x128xbf16>, vector<16x128xf32> -> vector<16x128xf32>
    %76 = arith.maximumf %64, %75 : vector<16x128xf32>
    %77 = vector.extract_strided_slice %2 {offsets = [0, 0, 5, 0], sizes = [1, 1, 1, 128], strides = [1, 1, 1, 1]} : vector<2x1x8x128xi32> to vector<1x1x1x128xi32>
    %78 = vector.shape_cast %77 : vector<1x1x1x128xi32> to vector<1x128xi32>
    %79 = vector.broadcast %78 : vector<1x128xi32> to vector<128x128xi32>
    %80 = arith.cmpi eq, %3, %79 : vector<128x128xi32>
    %81 = arith.extui %80 : vector<128x128xi1> to vector<128x128xi32>
    %82 = arith.sitofp %81 : vector<128x128xi32> to vector<128x128xf32>
    %83 = arith.truncf %82 : vector<128x128xf32> to vector<128x128xbf16>
    %cst_31 = arith.constant dense<0.000000e+00> : vector<16x128xf32>
    %84 = tpu.matmul %1, %83, %cst_31 {dimension_numbers = #tpu.dot_dimension_numbers<[1], [0], [0], [1], [0, 0, 1, 1], [], []>} : vector<16x128xbf16>, vector<128x128xbf16>, vector<16x128xf32> -> vector<16x128xf32>
    %85 = arith.truncf %84 : vector<16x128xf32> to vector<16x128xbf16>
    %c0_32 = arith.constant 0 : index
    %c0_33 = arith.constant 0 : index
    %86 = vector.load %arg5[%c0_32, %c0_33] : memref<16x16xbf16, #tpu.memory_space<vmem>>, vector<16x16xbf16>
    %cst_34 = arith.constant dense<0.000000e+00> : vector<16x128xf32>
    %87 = tpu.matmul %86, %85, %cst_34 {dimension_numbers = #tpu.dot_dimension_numbers<[1], [0], [0], [1], [0, 0, 1, 1], [], []>} : vector<16x16xbf16>, vector<16x128xbf16>, vector<16x128xf32> -> vector<16x128xf32>
    %88 = arith.maximumf %76, %87 : vector<16x128xf32>
    %89 = vector.extract_strided_slice %2 {offsets = [0, 0, 6, 0], sizes = [1, 1, 1, 128], strides = [1, 1, 1, 1]} : vector<2x1x8x128xi32> to vector<1x1x1x128xi32>
    %90 = vector.shape_cast %89 : vector<1x1x1x128xi32> to vector<1x128xi32>
    %91 = vector.broadcast %90 : vector<1x128xi32> to vector<128x128xi32>
    %92 = arith.cmpi eq, %3, %91 : vector<128x128xi32>
    %93 = arith.extui %92 : vector<128x128xi1> to vector<128x128xi32>
    %94 = arith.sitofp %93 : vector<128x128xi32> to vector<128x128xf32>
    %95 = arith.truncf %94 : vector<128x128xf32> to vector<128x128xbf16>
    %cst_35 = arith.constant dense<0.000000e+00> : vector<16x128xf32>
    %96 = tpu.matmul %1, %95, %cst_35 {dimension_numbers = #tpu.dot_dimension_numbers<[1], [0], [0], [1], [0, 0, 1, 1], [], []>} : vector<16x128xbf16>, vector<128x128xbf16>, vector<16x128xf32> -> vector<16x128xf32>
    %97 = arith.truncf %96 : vector<16x128xf32> to vector<16x128xbf16>
    %c0_36 = arith.constant 0 : index
    %c0_37 = arith.constant 0 : index
    %98 = vector.load %arg5[%c0_36, %c0_37] : memref<16x16xbf16, #tpu.memory_space<vmem>>, vector<16x16xbf16>
    %cst_38 = arith.constant dense<0.000000e+00> : vector<16x128xf32>
    %99 = tpu.matmul %98, %97, %cst_38 {dimension_numbers = #tpu.dot_dimension_numbers<[1], [0], [0], [1], [0, 0, 1, 1], [], []>} : vector<16x16xbf16>, vector<16x128xbf16>, vector<16x128xf32> -> vector<16x128xf32>
    %100 = arith.maximumf %88, %99 : vector<16x128xf32>
    %101 = vector.extract_strided_slice %2 {offsets = [0, 0, 7, 0], sizes = [1, 1, 1, 128], strides = [1, 1, 1, 1]} : vector<2x1x8x128xi32> to vector<1x1x1x128xi32>
    %102 = vector.shape_cast %101 : vector<1x1x1x128xi32> to vector<1x128xi32>
    %103 = vector.broadcast %102 : vector<1x128xi32> to vector<128x128xi32>
    %104 = arith.cmpi eq, %3, %103 : vector<128x128xi32>
    %105 = arith.extui %104 : vector<128x128xi1> to vector<128x128xi32>
    %106 = arith.sitofp %105 : vector<128x128xi32> to vector<128x128xf32>
    %107 = arith.truncf %106 : vector<128x128xf32> to vector<128x128xbf16>
    %cst_39 = arith.constant dense<0.000000e+00> : vector<16x128xf32>
    %108 = tpu.matmul %1, %107, %cst_39 {dimension_numbers = #tpu.dot_dimension_numbers<[1], [0], [0], [1], [0, 0, 1, 1], [], []>} : vector<16x128xbf16>, vector<128x128xbf16>, vector<16x128xf32> -> vector<16x128xf32>
    %109 = arith.truncf %108 : vector<16x128xf32> to vector<16x128xbf16>
    %c0_40 = arith.constant 0 : index
    %c0_41 = arith.constant 0 : index
    %110 = vector.load %arg5[%c0_40, %c0_41] : memref<16x16xbf16, #tpu.memory_space<vmem>>, vector<16x16xbf16>
    %cst_42 = arith.constant dense<0.000000e+00> : vector<16x128xf32>
    %111 = tpu.matmul %110, %109, %cst_42 {dimension_numbers = #tpu.dot_dimension_numbers<[1], [0], [0], [1], [0, 0, 1, 1], [], []>} : vector<16x16xbf16>, vector<16x128xbf16>, vector<16x128xf32> -> vector<16x128xf32>
    %112 = arith.maximumf %100, %111 : vector<16x128xf32>
    %113 = arith.addf %17, %112 : vector<16x128xf32>
    %cst_43 = arith.constant 0.000000e+00 : f32
    %114 = vector.broadcast %cst_43 : f32 to vector<16x128xf32>
    %115 = arith.maximumf %113, %114 : vector<16x128xf32>
    %c0_44 = arith.constant 0 : index
    %c0_45 = arith.constant 0 : index
    %c0_46 = arith.constant 0 : index
    %116 = vector.load %arg7[%c0_44, %c0_45, %c0_46] : memref<1x16x128xf32, #tpu.memory_space<vmem>>, vector<1x16x128xf32>
    %117 = vector.shape_cast %116 : vector<1x16x128xf32> to vector<16x128xf32>
    %118 = vector.shape_cast %115 : vector<16x128xf32> to vector<1x16x128xf32>
    tpu.vector_store %arg7[%c0_44, %c0_45, %c0_46], %118 {strides = array<i32>} : memref<1x16x128xf32, #tpu.memory_space<vmem>>, vector<1x16x128xf32>,
    return
  }
  func.func @transform_0(%arg0: i32, %arg1: i32) -> (i32, i32, i32, i32) {
    %c0_i32 = arith.constant 0 : i32
    %c0_i32_0 = arith.constant 0 : i32
    %c0_i32_1 = arith.constant 0 : i32
    return %c0_i32, %arg0, %c0_i32_0, %arg1 : i32, i32, i32, i32
  }
  func.func @transform_1(%arg0: i32, %arg1: i32) -> (i32, i32, i32) {
    %c0_i32 = arith.constant 0 : i32
    %c0_i32_0 = arith.constant 0 : i32
    %c0_i32_1 = arith.constant 0 : i32
    return %arg0, %c0_i32, %c0_i32_0 : i32, i32, i32
  }
  func.func @transform_2(%arg0: i32, %arg1: i32) -> (i32, i32) {
    %c0_i32 = arith.constant 0 : i32
    %c0_i32_0 = arith.constant 0 : i32
    %c0_i32_1 = arith.constant 0 : i32
    return %c0_i32, %c0_i32_0 : i32, i32
  }
  func.func @transform_3(%arg0: i32, %arg1: i32) -> (i32, i32) {
    %c0_i32 = arith.constant 0 : i32
    %c0_i32_0 = arith.constant 0 : i32
    %c0_i32_1 = arith.constant 0 : i32
    return %c0_i32, %c0_i32_0 : i32, i32
  }
  func.func @transform_4(%arg0: i32, %arg1: i32) -> (i32, i32) {
    %c0_i32 = arith.constant 0 : i32
    %c0_i32_0 = arith.constant 0 : i32
    %c0_i32_1 = arith.constant 0 : i32
    return %c0_i32, %c0_i32_0 : i32, i32
  }
  func.func @transform_5(%arg0: i32, %arg1: i32) -> (i32, i32, i32) {
    %c0_i32 = arith.constant 0 : i32
    %c0_i32_0 = arith.constant 0 : i32
    return %arg0, %c0_i32, %arg1 : i32, i32, i32
  }
}

</mosaic_0001>

<bundles_post_ra>
// kernel: tpu_custom_call.1
= control target key start
LH: loop header
LB: loop body
LE: loop exit
PB: predicated region body
PF: predicated region fallthrough
CT: control target
= control target key end

     0   :  { %s3449_s0 = inlined_call_operand.hbm [shape: s32[2,2,8,128], index: 0, kind: input, shape index: {}]   ;;  %s3450_s1 = inlined_call_operand.vmem [shape: bf16[2,16,128], index: 1, kind: input, shape index: {}]   ;;  %s3451_s2 = inlined_call_operand.hbm [shape: bf16[16,16], index: 2, kind: input, shape index: {}]   ;;  %s3452_s3 = inlined_call_operand.hbm [shape: bf16[16,16], index: 3, kind: input, shape index: {}]   ;;  %s3453_s4 = inlined_call_operand.vmem [shape: f32[16,1], index: 4, kind: input, shape index: {}]   ;;  %s3454_s5 = inlined_call_operand.hbm [shape: f32[2,16,128], index: 5, kind: output, shape index: {}]  }
   0x1   :  { %3461 = sst [smem:[#allocation13_spill]] %s3451_s2 }
   0x2   :  { %3462 = sst [smem:[#allocation14_spill]] %s3452_s3 }
   0x3   :  { %10 = vsyncpa [#allocation3], 0 }
   0x4   :  { %12 = vsyncpa [#allocation3 + $0x1], 0 }
   0x5   :  { %13 = vsyncpa [#allocation6], 0 }
   0x6   :  { %14 = vsyncpa [#allocation4], 0 }
   0x7   :  { %16 = vsyncpa [#allocation4 + $0x1], 0  ;;  %s2770_s18 = smov 0   ;;  %s2772_s19 = smov 0  }
   0x8   :  { %s2774_s20 = smov 0   ;;  %s2776_s21 = smov 0  }
   0x9   :  { %s2778_s22 = smov 0   ;;  %s2780_s23 = smov 0  }
   0xa LB: > { %3463 = sst [smem:[#allocation12_spill]] %s2723_s23  ;;  %s1806_s24 = sadd.s32 4294967295, %s2723_s23   ;;  %s2723_s23 = sphi %s2780_s23, %s22_s23   ;;  %s2719_s22 = sphi %s2778_s22, %s3484_s22   ;;  %s2715_s21 = sphi %s2776_s21, %s3483_s21   ;;  %s2711_s20 = sphi %s2774_s20, %s3482_s20   ;;  %s2707_s19 = sphi %s2772_s19, %s3481_s19   ;;  %s2703_s18 = sphi %s2770_s18, %s3480_s18  }
   0xb   : > { %s1807_s25 = sadd.s32 4294967294, %s2723_s23   ;;  %p50_p0 = scmp.ne.s32.totalorder %s2711_s20, %s2707_s19 }
   0xc   : > { %p51_p1 = scmp.eq.s32.totalorder %s2723_s23, 0  ;;  %p56_p2 = scmp.ne.s32.totalorder %s2707_s19, %s2703_s18 }
   0xd   : > { %p2807_p3 = scmp.eq.s32.totalorder %s1806_s24, 0  ;;  %p171_p5 = scmp.eq.s32.totalorder %s1806_s24, 1 }
   0xe   : > { %p2811_p4 = por %p51_p1, %p50_p0  ;;  %p177_p7 = scmp.eq.s32.totalorder %s1807_s25, 1 }
   0xf   : > { %s3464_s26 = scalar_select %p2807_p3, 1, 0 }
  0x10   : > { %p2817_p6 = por %p2807_p3, %p56_p2  ;;  %p2821_p8 = por %p171_p5, %p50_p0 }
  0x11   : > { %p1808_p9 = scmp.ge.s32.totalorder %s2723_s23, 1  ;;  %p2826_p10 = por %p177_p7, %p56_p2 }
  0x12   : > { %s3466_s28 = scalar_select %p2817_p6, 1, 0 }
  0x13   : > { %s3467_s29 = scalar_select %p2821_p8, 1, 0 }
  0x14   : > { %s3468_s30 = scalar_select %p2826_p10, 1, 0 }
  0x15   : > { %p184_p11 = scmp.lt.s32.totalorder %s2723_s23, 3  ;;  %s2725_s7 = smov [#allocation5]  }
  0x16   : > { %s196_s8 = sshll.u32 %s2725_s7, 4  ;;  %p2490_p1 = scmp.lt.s32.totalorder %s2723_s23, 2  ;;  %s197_s8 = int_to_ptr.vmem [resolvable:$true] %s196_s8 }
  0x17   : > { %p2831_p12 = pnand %p1808_p9, %p184_p11  ;;  %s2726_s11 = smov [#allocation7]  }
  0x18   : > { %p2847_p2 = pnand %p2490_p1, %p2811_p4  ;;  %s209_s12 = sshll.u32 %s2726_s11, 4  ;;  %s210_s12 = int_to_ptr.vmem [resolvable:$true] %s209_s12 }
  0x19   : > { %p2473_p13 = pneg %p2831_p12  ;;  %s2570_s13 = scalar_lea.vmem %s197_s8, 128 }
  0x1a   : > { %p2571_p9 = scmp.ne.s32.totalorder %s197_s8, %s2570_s13  ;;  %p2578_p0 = scmp.lt.s32.totalorder %s197_s8, %s197_s8 }
  0x1b   : > { %p2841_p5 = pnand %p2473_p13, %p2807_p3  ;;  %p2579_p10 = scmp.lt.s32.totalorder %s2570_s13, %s2570_s13 }
  0x1d   : > { %p2561_p7 = pneg %p2841_p5  ;;  %p2580_p8 = por %p2579_p10, %p2578_p0 }
  0x1f   : > { %p2573_p11 = pnand %p2571_p9, %p2561_p7 }
  0x21   : > { %p2574_p13 = pneg %p2573_p11 }
  0x23   : > { %p2581_p3 = pnand %p2580_p8, %p2574_p13 }
  0x25   : > { %2584 = shalt.err (!%p2581_p3)
}
  0x26   : > { %s2727_s14 = smov 64   ;;  %s2728_s15 = smov 4  }
  0x27   : > { %s3472_s2 = sld [smem:[#allocation13_spill]]  ;;  %s2596_s24 = scalar_lea.vmem %s210_s12, 128 }
  0x28   : > { %p2597_p4 = scmp.ne.s32.totalorder %s210_s12, %s2596_s24  ;;  %p2604_p11 = scmp.lt.s32.totalorder %s210_s12, %s210_s12 }
  0x29   : > { %p2605_p6 = scmp.lt.s32.totalorder %s2596_s24, %s2596_s24 }
  0x2a   : > { %p2599_p1 = pnand %p2597_p4, %p2561_p7 }
  0x2b   : > { %p2606_p10 = por %p2605_p6, %p2604_p11 }
  0x2c   : > { %p2600_p9 = pneg %p2599_p1 }
  0x2d   : > { %2476 = dma.hbm_to_vmem [thread:$0]  (!%p2841_p5), %s3472_s2, 128, %s197_s8, [#allocation6], %s2727_s14, %s2727_s14, %s2728_s15  }
  0x2e   : > { %p2607_p8 = pnand %p2606_p10, %p2600_p9 }
  0x30   : > { %2610 = shalt.err (!%p2607_p8)
}
  0x31   : > { %s3473_s3 = sld [smem:[#allocation14_spill]]  ;;  %s43_s7 = sadd.s32 1, %s2711_s20 }
  0x32   : > { %s34_s8 = sadd.s32 1, %s2719_s22  ;;  %s226_s11 = sand.u32 1, %s2711_s20  }
  0x33   : > { %p36_p3 = scmp.ge.s32.totalorder %s34_s8, 2  ;;  %s1812_s13 = sshll.u32 %s226_s11, 4 }
  0x34   : > { %s1813_s16 = sshll.u32 %s2719_s22, 7  ;;  %s230_s27 = scalar_lea.vmem [#allocation2], %s1812_s13 }
  0x35   : > { %s3486_s8 = smov (%p36_p3, %s34_s8), 0  ;;  %s2878_s24 = scalar_lea.hbm %s3449_s0, %s1813_s16 }
  0x36   : > { %s38_s25 = ssub.s32 %s2719_s22, %s3486_s8  ;;  %s237_s2 = sshll.u32 %s230_s27, 4  ;;  %s238_s2 = int_to_ptr.vmem [resolvable:$true] %s237_s2 }
  0x37   : > { %2479 = dma.hbm_to_vmem [thread:$0]  (!%p2841_p5), %s3473_s3, 128, %s210_s12, [#allocation6], %s2727_s14, %s2727_s14, %s2728_s15  }
  0x38   : > { %p41_p6 = scmp.eq.s32.totalorder %s38_s25, 0  ;;  %s227_s14 = scalar_lea.sflag [#allocation3], %s226_s11 }
  0x39   : > { %p2613_p0 = pneg %p2847_p2  ;;  %s2624_s15 = scalar_lea.vmem %s238_s2, 256 }
  0x3a   : > { %s2883_s12 = scalar_select %p41_p6, %s2711_s20, %s43_s7  }
  0x3b   : > { %p2625_p5 = scmp.ne.s32.totalorder %s238_s2, %s2624_s15  ;;  %s2729_s3 = smov [#allocation2]  }
  0x3c   : > { %s2629_s23 = sshll.u32 %s2729_s3, 4  ;;  %s2630_s23 = int_to_ptr.vmem [resolvable:$false] %s2629_s23 }
  0x3d   : > { %p2627_p7 = pnand %p2625_p5, %p2613_p0  ;;  %s2631_s9 = scalar_lea.vmem %s2630_s23, 512 }
  0x3e   : > { %p2632_p4 = scmp.lt.s32.totalorder %s238_s2, %s2630_s23  ;;  %p2633_p1 = scmp.lt.s32.totalorder %s2631_s9, %s2624_s15 }
  0x3f   : > { %p2628_p13 = pneg %p2627_p7 }
  0x40   : > { %p2634_p9 = por %p2633_p1, %p2632_p4 }
  0x42   : > { %p2635_p11 = pnand %p2634_p9, %p2628_p13 }
  0x44   : > { %2638 = shalt.err (!%p2635_p11)
}
  0x45   : > { %s2730_s13 = smov 256   ;;  %s2731_s7 = smov 128  }
  0x46   : > { %s2732_s11 = smov 8   ;;  %257 = sbr.rel (%p2831_p12) target bundleno = 1983 (0x7bf), region = 40 }
  0x47   : > { %2483 = dma.hbm_to_vmem [thread:$0]  (!%p2847_p2), %s2878_s24, 256, %s238_s2, %s227_s14, %s2730_s13, %s2731_s7, %s2732_s11  }
  0x48   : > { %s2893_s3 = sand.u32 (!%p2831_p12), 1, %s2707_s19   ;;  %p3474_p10 = scmp.ne.s32.totalorder (!%p2831_p12), %s3466_s28, 0 }
  0x49   : > { %s1815_s23 = sshll.u32 (!%p2831_p12), %s2893_s3, 4  ;;  %s260_s16 = scalar_lea.sflag (!%p2831_p12), [#allocation3], %s2893_s3 }
  0x4a   : > { %s2899_s17 = scalar_lea.vmem (!%p2831_p12), [#allocation2], %s1815_s23 }
  0x4b   : > { %2690 = dma.done.wait (%p3474_p10), %s260_s16, 256  }
  0x4c   : > { %2692 = vsyncadd (%p3474_p10), %s260_s16, 4294967040  ;;  %p3475_p2 = scmp.ne.s32.totalorder %s3464_s26, 0 }
  0x4e   : > { %2694 = dma.done.wait (%p3475_p2), [#allocation6], 256  }
  0x4f   : > { %2696 = vsyncadd (%p3475_p2), [#allocation6], 4294967040  ;;  %v313_v0 = vlaneseq  ;;  %v2733_v1 = vmov 0.0   ;;  %vm2734_vm0 = vmmov 0   ;;  %p303_p12 = scmp.lt.s32.totalorder %s2715_s21, 1  ;;  %v312_v8 = vld [vmem:[%s2899_s17 + $0x8] sm:$0xff] }
  0x50   : > { %2227 = vmatprep.subr.bf16.mxu0 %v2733_v1  ;;  %2243 = vmatprep.mubr.msk.bf16.mxu0 %vm2734_vm0, %v2733_v1  ;;  %v2735_v12 = vmov 1.0|1.0   ;;  %v440_v23 = vld [vmem:[%s3453_s4] sm:$0xff]  ;;  %v2736_v24 = vmov 0   ;;  %v441_v25 = vld [vmem:[%s3453_s4 + $0x8] sm:$0xff]  ;;  %s302_s15 = scalar_lea.vmem [#allocation8], %s1815_s23 }
  0x51   : > { %v2913_v2 = vshrl.u32 %v313_v0, 7  ;;  %2247 = vmatprep.subr.bf16.mxu1 %v2733_v1  ;;  %2249 = vmatprep.mubr.msk.bf16.mxu1 %vm2734_vm0, %v2733_v1  ;;  %s304_s2 = scalar_select %p303_p12, %s2715_s21, 1  ;;  %v3018_v26 = vld [vmem:[%s2899_s17] sm:$0xff]  ;;  %v3140_v47 = vld [vmem:[#allocation7] sm:$0xff]  }
  0x52   : > { %2555 = vset.pattern.permute.xlu0 %v2736_v24  ;;  %v2557_v33 = vld [vmem:[#allocation5] sm:$0xff]   ;;  %s1691_s9 = sshll.u32 %s302_s15, 4  ;;  %s2127_s13 = sshll.u32 %s2715_s21, 8  ;;  %s3396_s9 = int_to_ptr.vmem [resolvable:$true] %s1691_s9 }
  0x53   : > { %v332_v3 = vsub.s32 0, %v2913_v2  ;;  %s2126_s26 = sshll.u32 %s304_s2, 3  ;;  %v2921_v4 = vadd.s32 112, %v2913_v2  ;;  %v2924_v5 = vadd.s32 120, %v2913_v2  ;;  %v2927_v6 = vadd.s32 96, %v2913_v2  ;;  %444 = vperm.xlu0 %2555, %v440_v23   ;;  %s3401_s23 = scalar_lea.hbm %s3454_s5, %s2127_s13 }
  0x54   : > { %v2930_v7 = vadd.s32 104, %v2913_v2  ;;  %v2934_v9 = vadd.s32 80, %v2913_v2  ;;  %v2937_v10 = vadd.s32 88, %v2913_v2  ;;  %s2942_s10 = scalar_lea.vmem %s3450_s1, %s2126_s26  ;;  %v2955_v13 = vadd.s32 64, %v2913_v2  ;;  %s1677_s16 = scalar_lea.sflag [#allocation4], %s2893_s3 }
  0x55   : > { %v333_v11 = vrot.slane %v312_v8, %v332_v3  ;;  %v2958_v14 = vadd.s32 72, %v2913_v2  ;;  %v2965_v15 = vadd.s32 48, %v2913_v2  ;;  %v2968_v16 = vadd.s32 56, %v2913_v2  ;;  %v3004_v22 = vld [vmem:[%s2942_s10] sm:$0xff]   ;;  %s2639_s17 = scalar_lea.vmem %s3396_s9, 256  ;;  %p3476_p3 = scmp.ne.s32.totalorder %s3467_s29, 0 }
  0x56   : > { %v2975_v17 = vadd.s32 32, %v2913_v2  ;;  %v2978_v18 = vadd.s32 40, %v2913_v2  ;;  %v2985_v19 = vadd.s32 16, %v2913_v2  ;;  %v2988_v20 = vadd.s32 24, %v2913_v2  ;;  %p2640_p8 = scmp.ne.s32.totalorder %s3396_s9, %s2639_s17  ;;  %s2737_s21 = smov [#allocation8]  }
  0x57   : > { %vm348_vm1 = vcmp.eq.s32.totalorder %v2921_v4, %v333_v11  ;;  %vm349_vm2 = vcmp.eq.s32.totalorder %v2924_v5, %v333_v11  ;;  %vm346_vm3 = vcmp.eq.s32.totalorder %v2927_v6, %v333_v11  ;;  %vm347_vm4 = vcmp.eq.s32.totalorder %v2930_v7, %v333_v11  ;;  %449 = vperm.xlu0 %2555, %v441_v25   ;;  %s2643_s2 = sshll.u32 %s2737_s21, 4  ;;  %s2644_s2 = int_to_ptr.vmem [resolvable:$false] %s2643_s2 }
  0x58   : > { %vm1838_vm5 = vmpackc.low %vm349_vm2, %vm348_vm1  ;;  %vm344_vm7 = vcmp.eq.s32.totalorder %v2934_v9, %v333_v11  ;;  %vm345_vm8 = vcmp.eq.s32.totalorder %v2937_v10, %v333_v11  ;;  %vm342_vm10 = vcmp.eq.s32.totalorder %v2955_v13, %v333_v11  ;;  %vm343_vm11 = vcmp.eq.s32.totalorder %v2958_v14, %v333_v11  ;;  %p2641_p6 = pnand %p2640_p8, %p3476_p3  ;;  %s2645_s26 = scalar_lea.vmem %s2644_s2, 512 }
  0x59   : > { %2228 = vmatpush3.bf16.msk.msra.mxu0 %vm1838_vm5, %v2735_v12  ;;  %vm1840_vm6 = vmpackc.low %vm347_vm4, %vm346_vm3  ;;  %vm340_vm13 = vcmp.eq.s32.totalorder %v2965_v15, %v333_v11  ;;  %vm341_vm14 = vcmp.eq.s32.totalorder %v2968_v16, %v333_v11  ;;  %vm338_vm1 = vcmp.eq.s32.totalorder %v2975_v17, %v333_v11  ;;  %vm339_vm2 = vcmp.eq.s32.totalorder %v2978_v18, %v333_v11  ;;  %p2646_p5 = scmp.lt.s32.totalorder %s3396_s9, %s2644_s2  ;;  %p2647_p7 = scmp.lt.s32.totalorder %s2645_s26, %s2639_s17 }
  0x5a   : > { %2229 = vmatprep.subr.bf16.mxu0 %v2733_v1  ;;  %vm1842_vm9 = vmpackc.low %vm345_vm8, %vm344_vm7  ;;  %vm336_vm4 = vcmp.eq.s32.totalorder %v2985_v19, %v333_v11  ;;  %vm337_vm5 = vcmp.eq.s32.totalorder %v2988_v20, %v333_v11  ;;  %v2995_v21 = vadd.s32 8, %v2913_v2  ;;  %vm334_vm7 = vcmp.eq.s32.totalorder %v2913_v2, %v333_v11  ;;  %p2642_p0 = pneg %p2641_p6 }
  0x5b   : > { %vm1844_vm12 = vmpackc.low %vm343_vm11, %vm342_vm10  ;;  %v505_v28 = vrot.slane %v3018_v26, %v332_v3  ;;  %v657_v34 = vsub.s32 1, %v2913_v2  ;;  %v947_v36 = vsub.s32 3, %v2913_v2  ;;  %v802_v48 = vsub.s32 2, %v2913_v2  ;;  %p2648_p13 = por %p2647_p7, %p2646_p5 }
  0x5c   : > { %vm1846_vm15 = vmpackc.low %vm341_vm14, %vm340_vm13  ;;  %vm335_vm8 = vcmp.eq.s32.totalorder %v2995_v21, %v333_v11 }
  0x5d   : > { %2230 = vmatpush3.bf16.msk.msra.mxu0 %vm1840_vm6, %v2735_v12  ;;  %vm1848_vm3 = vmpackc.low %vm339_vm2, %vm338_vm1  ;;  %vm520_vm10 = vcmp.eq.s32.totalorder %v2921_v4, %v505_v28  ;;  %vm521_vm11 = vcmp.eq.s32.totalorder %v2924_v5, %v505_v28  ;;  %vm518_vm14 = vcmp.eq.s32.totalorder %v2927_v6, %v505_v28  ;;  %vm516_vm2 = vcmp.eq.s32.totalorder %v2934_v9, %v505_v28  ;;  %p2649_p4 = pnand %p2648_p13, %p2642_p0 }
  0x5e   : > { %2231 = vmatprep.subr.bf16.mxu0 %v2733_v1  ;;  %vm1850_vm6 = vmpackc.low %vm337_vm5, %vm336_vm4  ;;  %vm514_vm5 = vcmp.eq.s32.totalorder %v2955_v13, %v505_v28  ;;  %v658_v35 = vrot.slane %v3018_v26, %v657_v34  ;;  %v948_v37 = vrot.slane %v3018_v26, %v947_v36  ;;  %v803_v50 = vrot.slane %v3018_v26, %v802_v48 }
  0x5f   : > { %vm1872_vm13 = vmpackc.low %vm521_vm11, %vm520_vm10  ;;  %vm510_vm11 = vcmp.eq.s32.totalorder %v2975_v17, %v505_v28  ;;  %v1237_v48 = vsub.s32 5, %v2913_v2 }
  0x61   : > { %2232 = vmatpush3.bf16.msk.msra.mxu0 %vm1842_vm9, %v2735_v12  ;;  %vm1852_vm9 = vmpackc.low %vm335_vm8, %vm334_vm7  ;;  %vm512_vm8 = vcmp.eq.s32.totalorder %v2965_v15, %v505_v28 }
  0x62   : > { %2233 = vmatprep.subr.bf16.mxu0 %v2733_v1 }
  0x65   : > { %2234 = vmatpush3.bf16.msk.msra.mxu0 %vm1844_vm12, %v2735_v12  ;;  %vm457_vm12 = vcmask 130048  }
  0x66   : > { %2235 = vmatprep.subr.bf16.mxu0 %v2733_v1 }
  0x69   : > { %2236 = vmatpush3.bf16.msk.msra.mxu0 %vm1846_vm15, %v2735_v12  ;;  %vm519_vm15 = vcmp.eq.s32.totalorder %v2930_v7, %v505_v28 }
  0x6a   : > { %2237 = vmatprep.subr.bf16.mxu0 %v2733_v1  ;;  %vm1874_vm1 = vmpackc.low %vm519_vm15, %vm518_vm14  ;;  %vm508_vm15 = vcmp.eq.s32.totalorder %v2985_v19, %v505_v28 }
  0x6d   : > { %2238 = vmatpush3.bf16.msk.msra.mxu0 %vm1848_vm3, %v2735_v12  ;;  %vm517_vm3 = vcmp.eq.s32.totalorder %v2937_v10, %v505_v28 }
  0x6e   : > { %2239 = vmatprep.subr.bf16.mxu0 %v2733_v1  ;;  %vm1876_vm4 = vmpackc.low %vm517_vm3, %vm516_vm2  ;;  %vm506_vm3 = vcmp.eq.s32.totalorder %v2913_v2, %v505_v28 }
  0x71   : > { %2240 = vmatpush3.bf16.msk.msra.mxu0 %vm1850_vm6, %v2735_v12  ;;  %vm515_vm6 = vcmp.eq.s32.totalorder %v2958_v14, %v505_v28 }
  0x72   : > { %2241 = vmatprep.subr.bf16.mxu0 %v2733_v1  ;;  %vm1878_vm7 = vmpackc.low %vm515_vm6, %vm514_vm5  ;;  %vm673_vm6 = vcmp.eq.s32.totalorder %v2921_v4, %v658_v35 }
  0x75   : > { %2242 = vmatpush3.bf16.msk.msra.mxu0 %vm1852_vm9, %v2735_v12  ;;  %vm513_vm9 = vcmp.eq.s32.totalorder %v2968_v16, %v505_v28 }
  0x76   : > { %2273 = vmatprep.subr.bf16.mxu0 %v2733_v1  ;;  %vm1880_vm10 = vmpackc.low %vm513_vm9, %vm512_vm8  ;;  %vm671_vm9 = vcmp.eq.s32.totalorder %v2927_v6, %v658_v35 }
  0x78   : > { %2244 = vmatmul.mubr.bf16.vlgmr.msra.gmra.mxu0 %v3004_v22 }
  0x79   : > { %2275 = vmatprep.mubr.msk.bf16.mxu0 %vm2734_vm0, %v2733_v1 }
 0x138   : > { %v430_v27 = vpop.f32.mrf.mxu0 }
 0x13a   : > { %v2245_v29 = vpop.f32.mrf.mxu0 }
 0x13c   : > { %v433_v30 = vpop.f32.mrf.mxu0 }
 0x13d   : > { %v437_v31 = vpack.c.bf16 %v433_v30, %v430_v27  ;;  %v1092_v30 = vsub.s32 4, %v2913_v2 }
 0x13e   : > { %v2246_v32 = vpop.f32.mrf.mxu0 }
 0x13f   : > { %2248 = vmatpush3.bf16.msra.mxu1 %v437_v31  ;;  %v1093_v32 = vrot.slane %v3018_v26, %v1092_v30  ;;  %v1527_v30 = vsub.s32 7, %v2913_v2 }
 0x140   : > { %2253 = vmatprep.subr.bf16.mxu1 %v2733_v1 }
 0x142   : > { %2250 = vmatmul.mubr.msk.bf16.vlgmr.msra.gmra.mxu1 %vm457_vm12, %v2557_v33 }
 0x143   : > { %2254 = vmatpush3.bf16.msk.msra.mxu1 %vm1872_vm13, %v2735_v12  ;;  %2269 = vmatprep.mubr.msk.bf16.mxu1 %vm2734_vm0, %v2733_v1  ;;  %vm511_vm13 = vcmp.eq.s32.totalorder %v2978_v18, %v505_v28 }
 0x144   : > { %2255 = vmatprep.subr.bf16.mxu1 %v2733_v1  ;;  %vm1882_vm14 = vmpackc.low %vm511_vm13, %vm510_vm11  ;;  %vm669_vm13 = vcmp.eq.s32.totalorder %v2934_v9, %v658_v35 }
 0x147   : > { %2256 = vmatpush3.bf16.msk.msra.mxu1 %vm1874_vm1, %v2735_v12  ;;  %vm509_vm1 = vcmp.eq.s32.totalorder %v2988_v20, %v505_v28 }
 0x148   : > { %2257 = vmatprep.subr.bf16.mxu1 %v2733_v1  ;;  %vm1884_vm2 = vmpackc.low %vm509_vm1, %vm508_vm15  ;;  %vm667_vm1 = vcmp.eq.s32.totalorder %v2955_v13, %v658_v35 }
 0x14b   : > { %2258 = vmatpush3.bf16.msk.msra.mxu1 %vm1876_vm4, %v2735_v12  ;;  %vm507_vm4 = vcmp.eq.s32.totalorder %v2995_v21, %v505_v28 }
 0x14c   : > { %2259 = vmatprep.subr.bf16.mxu1 %v2733_v1  ;;  %vm1886_vm5 = vmpackc.low %vm507_vm4, %vm506_vm3  ;;  %vm665_vm4 = vcmp.eq.s32.totalorder %v2965_v15, %v658_v35 }
 0x14f   : > { %2260 = vmatpush3.bf16.msk.msra.mxu1 %vm1878_vm7, %v2735_v12  ;;  %vm674_vm7 = vcmp.eq.s32.totalorder %v2924_v5, %v658_v35 }
 0x150   : > { %2261 = vmatprep.subr.bf16.mxu1 %v2733_v1  ;;  %vm1906_vm8 = vmpackc.low %vm674_vm7, %vm673_vm6  ;;  %vm663_vm7 = vcmp.eq.s32.totalorder %v2975_v17, %v658_v35 }
 0x153   : > { %2262 = vmatpush3.bf16.msk.msra.mxu1 %vm1880_vm10, %v2735_v12  ;;  %vm672_vm10 = vcmp.eq.s32.totalorder %v2930_v7, %v658_v35 }
 0x154   : > { %2263 = vmatprep.subr.bf16.mxu1 %v2733_v1  ;;  %vm1908_vm11 = vmpackc.low %vm672_vm10, %vm671_vm9  ;;  %vm661_vm10 = vcmp.eq.s32.totalorder %v2985_v19, %v658_v35 }
 0x157   : > { %2264 = vmatpush3.bf16.msk.msra.mxu1 %vm1882_vm14, %v2735_v12  ;;  %vm670_vm14 = vcmp.eq.s32.totalorder %v2937_v10, %v658_v35 }
 0x158   : > { %2265 = vmatprep.subr.bf16.mxu1 %v2733_v1  ;;  %vm1910_vm15 = vmpackc.low %vm670_vm14, %vm669_vm13  ;;  %vm659_vm14 = vcmp.eq.s32.totalorder %v2913_v2, %v658_v35 }
 0x15b   : > { %2266 = vmatpush3.bf16.msk.msra.mxu1 %vm1884_vm2, %v2735_v12  ;;  %vm668_vm2 = vcmp.eq.s32.totalorder %v2958_v14, %v658_v35 }
 0x15c   : > { %2267 = vmatprep.subr.bf16.mxu1 %v2733_v1  ;;  %vm1912_vm3 = vmpackc.low %vm668_vm2, %vm667_vm1  ;;  %vm963_vm2 = vcmp.eq.s32.totalorder %v2921_v4, %v948_v37 }
 0x15f   : > { %2268 = vmatpush3.bf16.msk.msra.mxu1 %vm1886_vm5, %v2735_v12  ;;  %vm666_vm5 = vcmp.eq.s32.totalorder %v2968_v16, %v658_v35 }
 0x160   : > { %2279 = vmatprep.subr.bf16.mxu1 %v2733_v1  ;;  %vm1914_vm6 = vmpackc.low %vm666_vm5, %vm665_vm4  ;;  %vm961_vm5 = vcmp.eq.s32.totalorder %v2927_v6, %v948_v37 }
 0x162   : > { %2270 = vmatmul.mubr.bf16.vlgmr.msra.gmra.mxu1 %v3004_v22 }
 0x163   : > { %2280 = vmatpush3.bf16.msk.msra.mxu1 %vm1906_vm8, %v2735_v12  ;;  %2295 = vmatprep.mubr.msk.bf16.mxu1 %vm2734_vm0, %v2733_v1  ;;  %vm664_vm8 = vcmp.eq.s32.totalorder %v2978_v18, %v658_v35 }
 0x164   : > { %2281 = vmatprep.subr.bf16.mxu1 %v2733_v1  ;;  %vm1916_vm9 = vmpackc.low %vm664_vm8, %vm663_vm7  ;;  %vm959_vm8 = vcmp.eq.s32.totalorder %v2934_v9, %v948_v37 }
 0x167   : > { %2282 = vmatpush3.bf16.msk.msra.mxu1 %vm1908_vm11, %v2735_v12  ;;  %vm662_vm11 = vcmp.eq.s32.totalorder %v2988_v20, %v658_v35 }
 0x168   : > { %2283 = vmatprep.subr.bf16.mxu1 %v2733_v1  ;;  %vm1918_vm13 = vmpackc.low %vm662_vm11, %vm661_vm10  ;;  %vm957_vm11 = vcmp.eq.s32.totalorder %v2955_v13, %v948_v37 }
 0x16b   : > { %2284 = vmatpush3.bf16.msk.msra.mxu1 %vm1910_vm15, %v2735_v12  ;;  %vm660_vm15 = vcmp.eq.s32.totalorder %v2995_v21, %v658_v35 }
 0x16c   : > { %2285 = vmatprep.subr.bf16.mxu1 %v2733_v1  ;;  %vm1920_vm1 = vmpackc.low %vm660_vm15, %vm659_vm14  ;;  %vm955_vm15 = vcmp.eq.s32.totalorder %v2965_v15, %v948_v37 }
 0x16f   : > { %2286 = vmatpush3.bf16.msk.msra.mxu1 %vm1912_vm3, %v2735_v12  ;;  %vm964_vm3 = vcmp.eq.s32.totalorder %v2924_v5, %v948_v37 }
 0x170   : > { %2287 = vmatprep.subr.bf16.mxu1 %v2733_v1  ;;  %vm1972_vm4 = vmpackc.low %vm964_vm3, %vm963_vm2  ;;  %vm953_vm3 = vcmp.eq.s32.totalorder %v2975_v17, %v948_v37 }
 0x173   : > { %2288 = vmatpush3.bf16.msk.msra.mxu1 %vm1914_vm6, %v2735_v12  ;;  %vm962_vm6 = vcmp.eq.s32.totalorder %v2930_v7, %v948_v37 }
 0x174   : > { %2289 = vmatprep.subr.bf16.mxu1 %v2733_v1  ;;  %vm1974_vm7 = vmpackc.low %vm962_vm6, %vm961_vm5  ;;  %vm951_vm6 = vcmp.eq.s32.totalorder %v2985_v19, %v948_v37 }
 0x177   : > { %2290 = vmatpush3.bf16.msk.msra.mxu1 %vm1916_vm9, %v2735_v12  ;;  %vm960_vm9 = vcmp.eq.s32.totalorder %v2937_v10, %v948_v37 }
 0x178   : > { %2291 = vmatprep.subr.bf16.mxu1 %v2733_v1  ;;  %vm1976_vm10 = vmpackc.low %vm960_vm9, %vm959_vm8  ;;  %vm949_vm9 = vcmp.eq.s32.totalorder %v2913_v2, %v948_v37 }
 0x17b   : > { %2292 = vmatpush3.bf16.msk.msra.mxu1 %vm1918_vm13, %v2735_v12  ;;  %vm958_vm13 = vcmp.eq.s32.totalorder %v2958_v14, %v948_v37 }
 0x17c   : > { %2293 = vmatprep.subr.bf16.mxu1 %v2733_v1  ;;  %vm1978_vm14 = vmpackc.low %vm958_vm13, %vm957_vm11  ;;  %vm818_vm13 = vcmp.eq.s32.totalorder %v2921_v4, %v803_v50 }
 0x17f   : > { %2294 = vmatpush3.bf16.msk.msra.mxu1 %vm1920_vm1, %v2735_v12  ;;  %vm956_vm1 = vcmp.eq.s32.totalorder %v2968_v16, %v948_v37 }
 0x180   : > { %2331 = vmatprep.subr.bf16.mxu1 %v2733_v1  ;;  %vm1980_vm2 = vmpackc.low %vm956_vm1, %vm955_vm15  ;;  %vm816_vm1 = vcmp.eq.s32.totalorder %v2927_v6, %v803_v50 }
 0x182   : > { %2296 = vmatmul.mubr.bf16.vlgmr.msra.gmra.mxu1 %v3004_v22 }
 0x183   : > { %2347 = vmatprep.mubr.msk.bf16.mxu1 %vm2734_vm0, %v2733_v1  ;;  %2332 = vmatpush3.bf16.msk.msra.mxu1 %vm1972_vm4, %v2735_v12  ;;  %vm954_vm4 = vcmp.eq.s32.totalorder %v2978_v18, %v948_v37 }
 0x184   : > { %2333 = vmatprep.subr.bf16.mxu1 %v2733_v1  ;;  %vm1982_vm5 = vmpackc.low %vm954_vm4, %vm953_vm3  ;;  %vm814_vm4 = vcmp.eq.s32.totalorder %v2934_v9, %v803_v50 }
 0x187   : > { %2334 = vmatpush3.bf16.msk.msra.mxu1 %vm1974_vm7, %v2735_v12  ;;  %vm952_vm7 = vcmp.eq.s32.totalorder %v2988_v20, %v948_v37 }
 0x188   : > { %2335 = vmatprep.subr.bf16.mxu1 %v2733_v1  ;;  %vm1984_vm8 = vmpackc.low %vm952_vm7, %vm951_vm6  ;;  %vm812_vm7 = vcmp.eq.s32.totalorder %v2955_v13, %v803_v50 }
 0x18b   : > { %2336 = vmatpush3.bf16.msk.msra.mxu1 %vm1976_vm10, %v2735_v12  ;;  %vm950_vm10 = vcmp.eq.s32.totalorder %v2995_v21, %v948_v37 }
 0x18c   : > { %2337 = vmatprep.subr.bf16.mxu1 %v2733_v1  ;;  %vm1986_vm11 = vmpackc.low %vm950_vm10, %vm949_vm9  ;;  %vm810_vm10 = vcmp.eq.s32.totalorder %v2965_v15, %v803_v50 }
 0x18f   : > { %2338 = vmatpush3.bf16.msk.msra.mxu1 %vm1978_vm14, %v2735_v12  ;;  %vm819_vm14 = vcmp.eq.s32.totalorder %v2924_v5, %v803_v50 }
 0x190   : > { %2339 = vmatprep.subr.bf16.mxu1 %v2733_v1  ;;  %vm1939_vm15 = vmpackc.low %vm819_vm14, %vm818_vm13  ;;  %vm808_vm14 = vcmp.eq.s32.totalorder %v2975_v17, %v803_v50 }
 0x193   : > { %2340 = vmatpush3.bf16.msk.msra.mxu1 %vm1980_vm2, %v2735_v12  ;;  %vm817_vm2 = vcmp.eq.s32.totalorder %v2930_v7, %v803_v50 }
 0x194   : > { %2341 = vmatprep.subr.bf16.mxu1 %v2733_v1  ;;  %vm1941_vm3 = vmpackc.low %vm817_vm2, %vm816_vm1  ;;  %vm806_vm2 = vcmp.eq.s32.totalorder %v2985_v19, %v803_v50 }
 0x197   : > { %2342 = vmatpush3.bf16.msk.msra.mxu1 %vm1982_vm5, %v2735_v12  ;;  %vm815_vm5 = vcmp.eq.s32.totalorder %v2937_v10, %v803_v50 }
 0x198   : > { %2343 = vmatprep.subr.bf16.mxu1 %v2733_v1  ;;  %vm1943_vm6 = vmpackc.low %vm815_vm5, %vm814_vm4  ;;  %vm804_vm5 = vcmp.eq.s32.totalorder %v2913_v2, %v803_v50 }
 0x19b   : > { %2344 = vmatpush3.bf16.msk.msra.mxu1 %vm1984_vm8, %v2735_v12  ;;  %vm813_vm8 = vcmp.eq.s32.totalorder %v2958_v14, %v803_v50 }
 0x19c   : > { %2345 = vmatprep.subr.bf16.mxu1 %v2733_v1  ;;  %vm1945_vm9 = vmpackc.low %vm813_vm8, %vm812_vm7  ;;  %vm1108_vm8 = vcmp.eq.s32.totalorder %v2921_v4, %v1093_v32 }
 0x19f   : > { %2346 = vmatpush3.bf16.msk.msra.mxu1 %vm1986_vm11, %v2735_v12  ;;  %vm811_vm11 = vcmp.eq.s32.totalorder %v2968_v16, %v803_v50 }
 0x1a0   : > { %2377 = vmatprep.subr.bf16.mxu1 %v2733_v1  ;;  %vm1947_vm13 = vmpackc.low %vm811_vm11, %vm810_vm10  ;;  %vm1106_vm11 = vcmp.eq.s32.totalorder %v2927_v6, %v1093_v32 }
 0x1a2   : > { %2348 = vmatmul.mubr.bf16.vlgmr.msra.gmra.mxu1 %v3004_v22 }
 0x1a3   : > { %2379 = vmatprep.mubr.msk.bf16.mxu1 %vm2734_vm0, %v2733_v1 }
 0x202   : > { %v3136_v38 = vpop.f32.mrf.mxu1 }
 0x204   : > { %v2251_v39 = vpop.f32.mrf.mxu1 }
 0x206   : > { %v3138_v40 = vpop.f32.mrf.mxu1 }
 0x208   : > { %v2252_v41 = vpop.f32.mrf.mxu1 }
 0x222   : > { %v596_v42 = vpop.f32.mrf.mxu1 }
 0x224   : > { %v2271_v43 = vpop.f32.mrf.mxu1 }
 0x226   : > { %v599_v44 = vpop.f32.mrf.mxu1 }
 0x227   : > { %v603_v45 = vpack.c.bf16 %v599_v44, %v596_v42 }
 0x228   : > { %v2272_v46 = vpop.f32.mrf.mxu1 }
 0x229   : > { %2274 = vmatpush3.bf16.msra.mxu0 %v603_v45 }
 0x22a   : > { %2299 = vmatprep.subr.bf16.mxu0 %v2733_v1 }
 0x22c   : > { %2276 = vmatmul.mubr.msk.bf16.vlgmr.msra.gmra.mxu0 %vm457_vm12, %v3140_v47 }
 0x22d   : > { %2301 = vmatprep.mubr.msk.bf16.mxu0 %vm2734_vm0, %v2733_v1 }
 0x242   : > { %v749_v49 = vpop.f32.mrf.mxu1 }
 0x244   : > { %v2297_v51 = vpop.f32.mrf.mxu1 }
 0x246   : > { %v752_v52 = vpop.f32.mrf.mxu1 }
 0x247   : > { %v756_v53 = vpack.c.bf16 %v752_v52, %v749_v49 }
 0x248   : > { %v2298_v54 = vpop.f32.mrf.mxu1 }
 0x249   : > { %2300 = vmatpush3.bf16.msra.mxu0 %v756_v53 }
 0x24a   : > { %2305 = vmatprep.subr.bf16.mxu0 %v2733_v1 }
 0x24c   : > { %2302 = vmatmul.mubr.msk.bf16.vlgmr.msra.gmra.mxu0 %vm457_vm12, %v3140_v47 }
 0x24d   : > { %2306 = vmatpush3.bf16.msk.msra.mxu0 %vm1939_vm15, %v2735_v12  ;;  %2321 = vmatprep.mubr.msk.bf16.mxu0 %vm2734_vm0, %v2733_v1  ;;  %vm809_vm15 = vcmp.eq.s32.totalorder %v2978_v18, %v803_v50 }
 0x24e   : > { %2307 = vmatprep.subr.bf16.mxu0 %v2733_v1  ;;  %vm1949_vm1 = vmpackc.low %vm809_vm15, %vm808_vm14  ;;  %vm1104_vm15 = vcmp.eq.s32.totalorder %v2934_v9, %v1093_v32 }
 0x251   : > { %2308 = vmatpush3.bf16.msk.msra.mxu0 %vm1941_vm3, %v2735_v12  ;;  %vm807_vm3 = vcmp.eq.s32.totalorder %v2988_v20, %v803_v50 }
 0x252   : > { %2309 = vmatprep.subr.bf16.mxu0 %v2733_v1  ;;  %vm1951_vm4 = vmpackc.low %vm807_vm3, %vm806_vm2  ;;  %vm1102_vm3 = vcmp.eq.s32.totalorder %v2955_v13, %v1093_v32 }
 0x255   : > { %2310 = vmatpush3.bf16.msk.msra.mxu0 %vm1943_vm6, %v2735_v12  ;;  %vm805_vm6 = vcmp.eq.s32.totalorder %v2995_v21, %v803_v50  ;;  %v1238_v50 = vrot.slane %v3018_v26, %v1237_v48 }
 0x256   : > { %2311 = vmatprep.subr.bf16.mxu0 %v2733_v1  ;;  %vm1953_vm7 = vmpackc.low %vm805_vm6, %vm804_vm5  ;;  %vm1100_vm6 = vcmp.eq.s32.totalorder %v2965_v15, %v1093_v32 }
 0x259   : > { %2312 = vmatpush3.bf16.msk.msra.mxu0 %vm1945_vm9, %v2735_v12  ;;  %vm1109_vm9 = vcmp.eq.s32.totalorder %v2924_v5, %v1093_v32 }
 0x25a   : > { %2313 = vmatprep.subr.bf16.mxu0 %v2733_v1  ;;  %vm2005_vm10 = vmpackc.low %vm1109_vm9, %vm1108_vm8  ;;  %vm1098_vm9 = vcmp.eq.s32.totalorder %v2975_v17, %v1093_v32 }
 0x25d   : > { %2314 = vmatpush3.bf16.msk.msra.mxu0 %vm1947_vm13, %v2735_v12  ;;  %vm1107_vm13 = vcmp.eq.s32.totalorder %v2930_v7, %v1093_v32 }
 0x25e   : > { %2315 = vmatprep.subr.bf16.mxu0 %v2733_v1  ;;  %vm2007_vm14 = vmpackc.low %vm1107_vm13, %vm1106_vm11  ;;  %vm1096_vm13 = vcmp.eq.s32.totalorder %v2985_v19, %v1093_v32 }
 0x261   : > { %2316 = vmatpush3.bf16.msk.msra.mxu0 %vm1949_vm1, %v2735_v12  ;;  %vm1105_vm1 = vcmp.eq.s32.totalorder %v2937_v10, %v1093_v32 }
 0x262   : > { %2317 = vmatprep.subr.bf16.mxu0 %v2733_v1  ;;  %v1039_v55 = vpop.f32.mrf.mxu1  ;;  %vm2009_vm2 = vmpackc.low %vm1105_vm1, %vm1104_vm15  ;;  %vm1094_vm1 = vcmp.eq.s32.totalorder %v2913_v2, %v1093_v32 }
 0x264   : > { %v2349_v56 = vpop.f32.mrf.mxu1 }
 0x265   : > { %2318 = vmatpush3.bf16.msk.msra.mxu0 %vm1951_vm4, %v2735_v12  ;;  %vm1103_vm4 = vcmp.eq.s32.totalorder %v2958_v14, %v1093_v32 }
 0x266   : > { %2319 = vmatprep.subr.bf16.mxu0 %v2733_v1  ;;  %v1042_v57 = vpop.f32.mrf.mxu1  ;;  %vm2011_vm5 = vmpackc.low %vm1103_vm4, %vm1102_vm3  ;;  %vm1253_vm4 = vcmp.eq.s32.totalorder %v2921_v4, %v1238_v50 }
 0x267   : > { %v1046_v58 = vpack.c.bf16 %v1042_v57, %v1039_v55 }
 0x268   : > { %v2350_v59 = vpop.f32.mrf.mxu1 }
 0x269   : > { %2320 = vmatpush3.bf16.msk.msra.mxu0 %vm1953_vm7, %v2735_v12  ;;  %vm1101_vm7 = vcmp.eq.s32.totalorder %v2968_v16, %v1093_v32 }
 0x26a   : > { %2325 = vmatprep.subr.bf16.mxu0 %v2733_v1  ;;  %vm2013_vm8 = vmpackc.low %vm1101_vm7, %vm1100_vm6  ;;  %vm1251_vm7 = vcmp.eq.s32.totalorder %v2927_v6, %v1238_v50 }
 0x26c   : > { %2322 = vmatmul.mubr.bf16.vlgmr.msra.gmra.mxu0 %v3004_v22 }
 0x26d   : > { %2327 = vmatprep.mubr.msk.bf16.mxu0 %vm2734_vm0, %v2733_v1 }
 0x2ec   : > { %v3189_v60 = vpop.f32.mrf.mxu0 }
 0x2ee   : > { %v2277_v61 = vpop.f32.mrf.mxu0 }
 0x2ef   : > { %v1382_v61 = vsub.s32 6, %v2913_v2 }
 0x2f0   : > { %v3191_v62 = vpop.f32.mrf.mxu0 }
 0x2f2   : > { %v2278_v63 = vpop.f32.mrf.mxu0 }
 0x2f3   : > { %v1383_v63 = vrot.slane %v3018_v26, %v1382_v61 }
 0x30c   : > { %v3193_v0 = vpop.f32.mrf.mxu0 }
 0x30d   : > { %v798_v3 = vmax.f32 %v3189_v60, %v3193_v0 }
 0x30e   : > { %v2303_v8 = vpop.f32.mrf.mxu0 }
 0x310   : > { %v3197_v11 = vpop.f32.mrf.mxu0 }
 0x311   : > { %v799_v23 = vmax.f32 %v3191_v62, %v3197_v11 }
 0x312   : > { %v2304_v24 = vpop.f32.mrf.mxu0 }
 0x32c   : > { %v894_v25 = vpop.f32.mrf.mxu0 }
 0x32e   : > { %v2323_v27 = vpop.f32.mrf.mxu0 }
 0x330   : > { %v897_v28 = vpop.f32.mrf.mxu0 }
 0x331   : > { %v901_v29 = vpack.c.bf16 %v897_v28, %v894_v25 }
 0x332   : > { %v2324_v31 = vpop.f32.mrf.mxu0 }
 0x333   : > { %2326 = vmatpush3.bf16.msra.mxu0 %v901_v29 }
 0x334   : > { %2351 = vmatprep.subr.bf16.mxu0 %v2733_v1 }
 0x336   : > { %2328 = vmatmul.mubr.msk.bf16.vlgmr.msra.gmra.mxu0 %vm457_vm12, %v3140_v47 }
 0x337   : > { %2352 = vmatpush3.bf16.msra.mxu0 %v1046_v58  ;;  %2353 = vmatprep.mubr.msk.bf16.mxu0 %vm2734_vm0, %v2733_v1 }
 0x338   : > { %2357 = vmatprep.subr.bf16.mxu0 %v2733_v1 }
 0x33e   : > { %2354 = vmatmul.mubr.msk.bf16.vlgmr.msra.gmra.mxu0 %vm457_vm12, %v3140_v47 }
 0x33f   : > { %2358 = vmatpush3.bf16.msk.msra.mxu0 %vm2005_vm10, %v2735_v12  ;;  %2373 = vmatprep.mubr.msk.bf16.mxu0 %vm2734_vm0, %v2733_v1  ;;  %vm1099_vm10 = vcmp.eq.s32.totalorder %v2978_v18, %v1093_v32 }
 0x340   : > { %2359 = vmatprep.subr.bf16.mxu0 %v2733_v1  ;;  %vm2015_vm11 = vmpackc.low %vm1099_vm10, %vm1098_vm9  ;;  %vm1249_vm10 = vcmp.eq.s32.totalorder %v2934_v9, %v1238_v50 }
 0x343   : > { %2360 = vmatpush3.bf16.msk.msra.mxu0 %vm2007_vm14, %v2735_v12  ;;  %vm1097_vm14 = vcmp.eq.s32.totalorder %v2988_v20, %v1093_v32 }
 0x344   : > { %2361 = vmatprep.subr.bf16.mxu0 %v2733_v1  ;;  %vm2017_vm15 = vmpackc.low %vm1097_vm14, %vm1096_vm13  ;;  %vm1247_vm14 = vcmp.eq.s32.totalorder %v2955_v13, %v1238_v50 }
 0x347   : > { %2362 = vmatpush3.bf16.msk.msra.mxu0 %vm2009_vm2, %v2735_v12  ;;  %vm1095_vm2 = vcmp.eq.s32.totalorder %v2995_v21, %v1093_v32  ;;  %v1528_v32 = vrot.slane %v3018_v26, %v1527_v30 }
 0x348   : > { %2363 = vmatprep.subr.bf16.mxu0 %v2733_v1  ;;  %vm2019_vm3 = vmpackc.low %vm1095_vm2, %vm1094_vm1  ;;  %vm1245_vm2 = vcmp.eq.s32.totalorder %v2965_v15, %v1238_v50 }
 0x34b   : > { %2364 = vmatpush3.bf16.msk.msra.mxu0 %vm2011_vm5, %v2735_v12  ;;  %vm1254_vm5 = vcmp.eq.s32.totalorder %v2924_v5, %v1238_v50 }
 0x34c   : > { %2365 = vmatprep.subr.bf16.mxu0 %v2733_v1  ;;  %vm2038_vm6 = vmpackc.low %vm1254_vm5, %vm1253_vm4  ;;  %vm1243_vm5 = vcmp.eq.s32.totalorder %v2975_v17, %v1238_v50 }
 0x34f   : > { %2366 = vmatpush3.bf16.msk.msra.mxu0 %vm2013_vm8, %v2735_v12  ;;  %vm1252_vm8 = vcmp.eq.s32.totalorder %v2930_v7, %v1238_v50 }
 0x350   : > { %2367 = vmatprep.subr.bf16.mxu0 %v2733_v1  ;;  %vm2040_vm9 = vmpackc.low %vm1252_vm8, %vm1251_vm7  ;;  %vm1241_vm8 = vcmp.eq.s32.totalorder %v2985_v19, %v1238_v50 }
 0x353   : > { %2368 = vmatpush3.bf16.msk.msra.mxu0 %vm2015_vm11, %v2735_v12  ;;  %vm1250_vm11 = vcmp.eq.s32.totalorder %v2937_v10, %v1238_v50 }
 0x354   : > { %2369 = vmatprep.subr.bf16.mxu0 %v2733_v1  ;;  %vm2042_vm13 = vmpackc.low %vm1250_vm11, %vm1249_vm10  ;;  %vm1239_vm11 = vcmp.eq.s32.totalorder %v2913_v2, %v1238_v50 }
 0x357   : > { %2370 = vmatpush3.bf16.msk.msra.mxu0 %vm2017_vm15, %v2735_v12  ;;  %vm1248_vm15 = vcmp.eq.s32.totalorder %v2958_v14, %v1238_v50 }
 0x358   : > { %2371 = vmatprep.subr.bf16.mxu0 %v2733_v1  ;;  %vm2044_vm1 = vmpackc.low %vm1248_vm15, %vm1247_vm14  ;;  %vm1398_vm15 = vcmp.eq.s32.totalorder %v2921_v4, %v1383_v63 }
 0x35b   : > { %2372 = vmatpush3.bf16.msk.msra.mxu0 %vm2019_vm3, %v2735_v12  ;;  %vm1246_vm3 = vcmp.eq.s32.totalorder %v2968_v16, %v1238_v50 }
 0x35c   : > { %2403 = vmatprep.subr.bf16.mxu0 %v2733_v1  ;;  %vm2046_vm4 = vmpackc.low %vm1246_vm3, %vm1245_vm2  ;;  %vm1396_vm3 = vcmp.eq.s32.totalorder %v2927_v6, %v1383_v63 }
 0x35e   : > { %2374 = vmatmul.mubr.bf16.vlgmr.msra.gmra.mxu0 %v3004_v22 }
 0x35f   : > { %2405 = vmatprep.mubr.msk.bf16.mxu0 %vm2734_vm0, %v2733_v1 }
 0x3f6   : > { %v936_v33 = vpop.f32.mrf.mxu0 }
 0x3f7   : > { %v3251_v34 = vmax.f32 %v798_v3, %v936_v33 }
 0x3f8   : > { %v2329_v35 = vpop.f32.mrf.mxu0 }
 0x3fa   : > { %v939_v36 = vpop.f32.mrf.mxu0 }
 0x3fb   : > { %v3256_v37 = vmax.f32 %v799_v23, %v939_v36 }
 0x3fc   : > { %v2330_v39 = vpop.f32.mrf.mxu0 }
 0x3fe   : > { %v1081_v41 = vpop.f32.mrf.mxu0 }
 0x3ff   : > { %v1088_v42 = vmax.f32 %v3251_v34, %v1081_v41 }
 0x400   : > { %v2355_v43 = vpop.f32.mrf.mxu0 }
 0x402   : > { %v1084_v44 = vpop.f32.mrf.mxu0 }
 0x403   : > { %v1089_v45 = vmax.f32 %v3256_v37, %v1084_v44 }
 0x404   : > { %v2356_v46 = vpop.f32.mrf.mxu0 }
 0x41e   : > { %v1184_v49 = vpop.f32.mrf.mxu0 }
 0x420   : > { %v2375_v51 = vpop.f32.mrf.mxu0 }
 0x422   : > { %v1187_v52 = vpop.f32.mrf.mxu0 }
 0x423   : > { %v1191_v53 = vpack.c.bf16 %v1187_v52, %v1184_v49 }
 0x424   : > { %v2376_v54 = vpop.f32.mrf.mxu0 }
 0x425   : > { %2378 = vmatpush3.bf16.msra.mxu1 %v1191_v53 }
 0x426   : > { %2383 = vmatprep.subr.bf16.mxu1 %v2733_v1 }
 0x428   : > { %2380 = vmatmul.mubr.msk.bf16.vlgmr.msra.gmra.mxu1 %vm457_vm12, %v3140_v47 }
 0x429   : > { %2384 = vmatpush3.bf16.msk.msra.mxu1 %vm2038_vm6, %v2735_v12  ;;  %2399 = vmatprep.mubr.msk.bf16.mxu1 %vm2734_vm0, %v2733_v1  ;;  %vm1244_vm6 = vcmp.eq.s32.totalorder %v2978_v18, %v1238_v50 }
 0x42a   : > { %2385 = vmatprep.subr.bf16.mxu1 %v2733_v1  ;;  %vm2048_vm7 = vmpackc.low %vm1244_vm6, %vm1243_vm5  ;;  %vm1394_vm6 = vcmp.eq.s32.totalorder %v2934_v9, %v1383_v63 }
 0x42d   : > { %2386 = vmatpush3.bf16.msk.msra.mxu1 %vm2040_vm9, %v2735_v12  ;;  %vm1242_vm9 = vcmp.eq.s32.totalorder %v2988_v20, %v1238_v50 }
 0x42e   : > { %2387 = vmatprep.subr.bf16.mxu1 %v2733_v1  ;;  %vm2050_vm10 = vmpackc.low %vm1242_vm9, %vm1241_vm8  ;;  %vm1392_vm9 = vcmp.eq.s32.totalorder %v2955_v13, %v1383_v63 }
 0x431   : > { %2388 = vmatpush3.bf16.msk.msra.mxu1 %vm2042_vm13, %v2735_v12  ;;  %vm1240_vm13 = vcmp.eq.s32.totalorder %v2995_v21, %v1238_v50 }
 0x432   : > { %2389 = vmatprep.subr.bf16.mxu1 %v2733_v1  ;;  %vm2052_vm14 = vmpackc.low %vm1240_vm13, %vm1239_vm11  ;;  %vm1390_vm13 = vcmp.eq.s32.totalorder %v2965_v15, %v1383_v63 }
 0x435   : > { %2390 = vmatpush3.bf16.msk.msra.mxu1 %vm2044_vm1, %v2735_v12  ;;  %vm1399_vm1 = vcmp.eq.s32.totalorder %v2924_v5, %v1383_v63 }
 0x436   : > { %2391 = vmatprep.subr.bf16.mxu1 %v2733_v1  ;;  %vm2071_vm2 = vmpackc.low %vm1399_vm1, %vm1398_vm15  ;;  %vm1388_vm1 = vcmp.eq.s32.totalorder %v2975_v17, %v1383_v63 }
 0x439   : > { %2392 = vmatpush3.bf16.msk.msra.mxu1 %vm2046_vm4, %v2735_v12  ;;  %vm1397_vm4 = vcmp.eq.s32.totalorder %v2930_v7, %v1383_v63 }
 0x43a   : > { %2393 = vmatprep.subr.bf16.mxu1 %v2733_v1  ;;  %vm2073_vm5 = vmpackc.low %vm1397_vm4, %vm1396_vm3  ;;  %vm1386_vm4 = vcmp.eq.s32.totalorder %v2985_v19, %v1383_v63 }
 0x43d   : > { %2394 = vmatpush3.bf16.msk.msra.mxu1 %vm2048_vm7, %v2735_v12  ;;  %vm1395_vm7 = vcmp.eq.s32.totalorder %v2937_v10, %v1383_v63 }
 0x43e   : > { %2395 = vmatprep.subr.bf16.mxu1 %v2733_v1  ;;  %vm2075_vm8 = vmpackc.low %vm1395_vm7, %vm1394_vm6  ;;  %vm1384_vm7 = vcmp.eq.s32.totalorder %v2913_v2, %v1383_v63 }
 0x441   : > { %2396 = vmatpush3.bf16.msk.msra.mxu1 %vm2050_vm10, %v2735_v12  ;;  %vm1393_vm10 = vcmp.eq.s32.totalorder %v2958_v14, %v1383_v63 }
 0x442   : > { %2397 = vmatprep.subr.bf16.mxu1 %v2733_v1  ;;  %vm2077_vm11 = vmpackc.low %vm1393_vm10, %vm1392_vm9  ;;  %vm1543_vm10 = vcmp.eq.s32.totalorder %v2921_v4, %v1528_v32 }
 0x445   : > { %2398 = vmatpush3.bf16.msk.msra.mxu1 %vm2052_vm14, %v2735_v12  ;;  %vm1391_vm14 = vcmp.eq.s32.totalorder %v2968_v16, %v1383_v63 }
 0x446   : > { %2429 = vmatprep.subr.bf16.mxu1 %v2733_v1  ;;  %vm2079_vm15 = vmpackc.low %vm1391_vm14, %vm1390_vm13  ;;  %vm1541_vm14 = vcmp.eq.s32.totalorder %v2927_v6, %v1528_v32 }
 0x448   : > { %2400 = vmatmul.mubr.bf16.vlgmr.msra.gmra.mxu1 %v3004_v22 }
 0x449   : > { %2431 = vmatprep.mubr.msk.bf16.mxu1 %vm2734_vm0, %v2733_v1 }
 0x4e8   : > { %v1226_v55 = vpop.f32.mrf.mxu1 }
 0x4e9   : > { %v3302_v56 = vmax.f32 %v1088_v42, %v1226_v55 }
 0x4ea   : > { %v2381_v57 = vpop.f32.mrf.mxu1 }
 0x4ec   : > { %v1229_v58 = vpop.f32.mrf.mxu1 }
 0x4ed   : > { %v3304_v59 = vmax.f32 %v1089_v45, %v1229_v58 }
 0x4ee   : > { %v2382_v60 = vpop.f32.mrf.mxu1 }
 0x508   : > { %v1329_v62 = vpop.f32.mrf.mxu1 }
 0x50a   : > { %v2401_v0 = vpop.f32.mrf.mxu1 }
 0x50c   : > { %v1332_v3 = vpop.f32.mrf.mxu1 }
 0x50d   : > { %v1336_v8 = vpack.c.bf16 %v1332_v3, %v1329_v62 }
 0x50e   : > { %v2402_v11 = vpop.f32.mrf.mxu1 }
 0x50f   : > { %2404 = vmatpush3.bf16.msra.mxu0 %v1336_v8 }
 0x510   : > { %2409 = vmatprep.subr.bf16.mxu0 %v2733_v1 }
 0x512   : > { %2406 = vmatmul.mubr.msk.bf16.vlgmr.msra.gmra.mxu0 %vm457_vm12, %v3140_v47 }
 0x513   : > { %2410 = vmatpush3.bf16.msk.msra.mxu0 %vm2071_vm2, %v2735_v12  ;;  %2425 = vmatprep.mubr.msk.bf16.mxu0 %vm2734_vm0, %v2733_v1  ;;  %vm1389_vm2 = vcmp.eq.s32.totalorder %v2978_v18, %v1383_v63 }
 0x514   : > { %2411 = vmatprep.subr.bf16.mxu0 %v2733_v1  ;;  %vm2081_vm3 = vmpackc.low %vm1389_vm2, %vm1388_vm1  ;;  %vm1539_vm2 = vcmp.eq.s32.totalorder %v2934_v9, %v1528_v32 }
 0x517   : > { %2412 = vmatpush3.bf16.msk.msra.mxu0 %vm2073_vm5, %v2735_v12  ;;  %vm1387_vm5 = vcmp.eq.s32.totalorder %v2988_v20, %v1383_v63 }
 0x518   : > { %2413 = vmatprep.subr.bf16.mxu0 %v2733_v1  ;;  %vm2083_vm6 = vmpackc.low %vm1387_vm5, %vm1386_vm4  ;;  %vm1537_vm5 = vcmp.eq.s32.totalorder %v2955_v13, %v1528_v32 }
 0x51b   : > { %2414 = vmatpush3.bf16.msk.msra.mxu0 %vm2075_vm8, %v2735_v12  ;;  %vm1385_vm8 = vcmp.eq.s32.totalorder %v2995_v21, %v1383_v63 }
 0x51c   : > { %2415 = vmatprep.subr.bf16.mxu0 %v2733_v1  ;;  %vm2085_vm9 = vmpackc.low %vm1385_vm8, %vm1384_vm7  ;;  %vm1535_vm7 = vcmp.eq.s32.totalorder %v2965_v15, %v1528_v32  ;;  %vm1536_vm8 = vcmp.eq.s32.totalorder %v2968_v16, %v1528_v32 }
 0x51f   : > { %2416 = vmatpush3.bf16.msk.msra.mxu0 %vm2077_vm11, %v2735_v12  ;;  %vm1544_vm11 = vcmp.eq.s32.totalorder %v2924_v5, %v1528_v32 }
 0x520   : > { %2417 = vmatprep.subr.bf16.mxu0 %v2733_v1  ;;  %vm2104_vm13 = vmpackc.low %vm1544_vm11, %vm1543_vm10  ;;  %vm1533_vm10 = vcmp.eq.s32.totalorder %v2975_v17, %v1528_v32  ;;  %vm1534_vm11 = vcmp.eq.s32.totalorder %v2978_v18, %v1528_v32 }
 0x523   : > { %2418 = vmatpush3.bf16.msk.msra.mxu0 %vm2079_vm15, %v2735_v12  ;;  %vm1542_vm15 = vcmp.eq.s32.totalorder %v2930_v7, %v1528_v32 }
 0x524   : > { %2419 = vmatprep.subr.bf16.mxu0 %v2733_v1  ;;  %vm2106_vm1 = vmpackc.low %vm1542_vm15, %vm1541_vm14  ;;  %vm1531_vm14 = vcmp.eq.s32.totalorder %v2985_v19, %v1528_v32  ;;  %vm1532_vm15 = vcmp.eq.s32.totalorder %v2988_v20, %v1528_v32 }
 0x527   : > { %2420 = vmatpush3.bf16.msk.msra.mxu0 %vm2081_vm3, %v2735_v12  ;;  %vm1540_vm3 = vcmp.eq.s32.totalorder %v2937_v10, %v1528_v32 }
 0x528   : > { %2421 = vmatprep.subr.bf16.mxu0 %v2733_v1  ;;  %vm2108_vm4 = vmpackc.low %vm1540_vm3, %vm1539_vm2  ;;  %vm1529_vm2 = vcmp.eq.s32.totalorder %v2913_v2, %v1528_v32  ;;  %vm1530_vm3 = vcmp.eq.s32.totalorder %v2995_v21, %v1528_v32 }
 0x52b   : > { %2422 = vmatpush3.bf16.msk.msra.mxu0 %vm2083_vm6, %v2735_v12  ;;  %vm1538_vm6 = vcmp.eq.s32.totalorder %v2958_v14, %v1528_v32 }
 0x52c   : > { %2423 = vmatprep.subr.bf16.mxu0 %v2733_v1 }
 0x52f   : > { %2424 = vmatpush3.bf16.msk.msra.mxu0 %vm2085_vm9, %v2735_v12  ;;  %vm2112_vm9 = vmpackc.low %vm1536_vm8, %vm1535_vm7 }
 0x530   : > { %2455 = vmatprep.subr.bf16.mxu0 %v2733_v1 }
 0x532   : > { %2426 = vmatmul.mubr.bf16.vlgmr.msra.gmra.mxu0 %v3004_v22 }
 0x533   : > { %2457 = vmatprep.mubr.msk.bf16.mxu0 %vm2734_vm0, %v2733_v1 }
 0x5d2   : > { %v1371_v23 = vpop.f32.mrf.mxu0 }
 0x5d3   : > { %v1378_v24 = vmax.f32 %v3302_v56, %v1371_v23 }
 0x5d4   : > { %v2407_v25 = vpop.f32.mrf.mxu0 }
 0x5d6   : > { %v1374_v27 = vpop.f32.mrf.mxu0 }
 0x5d7   : > { %v1379_v28 = vmax.f32 %v3304_v59, %v1374_v27 }
 0x5d8   : > { %v2408_v29 = vpop.f32.mrf.mxu0 }
 0x5f2   : > { %v1474_v31 = vpop.f32.mrf.mxu0 }
 0x5f4   : > { %v2427_v33 = vpop.f32.mrf.mxu0 }
 0x5f6   : > { %v1477_v34 = vpop.f32.mrf.mxu0 }
 0x5f7   : > { %v1481_v35 = vpack.c.bf16 %v1477_v34, %v1474_v31 }
 0x5f8   : > { %v2428_v36 = vpop.f32.mrf.mxu0 }
 0x5f9   : > { %2430 = vmatpush3.bf16.msra.mxu1 %v1481_v35 }
 0x5fa   : > { %2435 = vmatprep.subr.bf16.mxu1 %v2733_v1 }
 0x5fc   : > { %2432 = vmatmul.mubr.msk.bf16.vlgmr.msra.gmra.mxu1 %vm457_vm12, %v3140_v47 }
 0x5fd   : > { %2436 = vmatpush3.bf16.msk.msra.mxu1 %vm2104_vm13, %v2735_v12  ;;  %2451 = vmatprep.mubr.msk.bf16.mxu1 %vm2734_vm0, %v2733_v1  ;;  %vm2110_vm0 = vmpackc.low %vm1538_vm6, %vm1537_vm5 }
 0x5fe   : > { %2437 = vmatprep.subr.bf16.mxu1 %v2733_v1  ;;  %vm2114_vm13 = vmpackc.low %vm1534_vm11, %vm1533_vm10 }
 0x601   : > { %2438 = vmatpush3.bf16.msk.msra.mxu1 %vm2106_vm1, %v2735_v12  ;;  %vm2116_vm1 = vmpackc.low %vm1532_vm15, %vm1531_vm14 }
 0x602   : > { %2439 = vmatprep.subr.bf16.mxu1 %v2733_v1 }
 0x605   : > { %2440 = vmatpush3.bf16.msk.msra.mxu1 %vm2108_vm4, %v2735_v12  ;;  %vm2118_vm4 = vmpackc.low %vm1530_vm3, %vm1529_vm2 }
 0x606   : > { %2441 = vmatprep.subr.bf16.mxu1 %v2733_v1 }
 0x609   : > { %2442 = vmatpush3.bf16.msk.msra.mxu1 %vm2110_vm0, %v2735_v12 }
 0x60a   : > { %2443 = vmatprep.subr.bf16.mxu1 %v2733_v1 }
 0x60d   : > { %2444 = vmatpush3.bf16.msk.msra.mxu1 %vm2112_vm9, %v2735_v12 }
 0x60e   : > { %2445 = vmatprep.subr.bf16.mxu1 %v2733_v1 }
 0x611   : > { %2446 = vmatpush3.bf16.msk.msra.mxu1 %vm2114_vm13, %v2735_v12 }
 0x612   : > { %2447 = vmatprep.subr.bf16.mxu1 %v2733_v1 }
 0x615   : > { %2448 = vmatpush3.bf16.msk.msra.mxu1 %vm2116_vm1, %v2735_v12 }
 0x616   : > { %2449 = vmatprep.subr.bf16.mxu1 %v2733_v1  ;;  %v445_v1 = vpop.permute.xlu0 %444 }
 0x617   : > { %v496_v17 = vadd.f32 %v3136_v38, %v445_v1 }
 0x619   : > { %2450 = vmatpush3.bf16.msk.msra.mxu1 %vm2118_vm4, %v2735_v12 }
 0x61a   : > { %v450_v19 = vpop.permute.xlu0 %449 }
 0x61b   : > { %v499_v26 = vadd.f32 %v3138_v40, %v450_v19 }
 0x61c   : > { %2452 = vmatmul.mubr.bf16.vlgmr.msra.gmra.mxu1 %v3004_v22 }
 0x6bc   : > { %v1516_v4 = vpop.f32.mrf.mxu1 }
 0x6bd   : > { %v1523_v5 = vmax.f32 %v1378_v24, %v1516_v4 }
 0x6be   : > { %v2433_v6 = vpop.f32.mrf.mxu1 }
 0x6c0   : > { %v1519_v7 = vpop.f32.mrf.mxu1 }
 0x6c1   : > { %v1524_v9 = vmax.f32 %v1379_v28, %v1519_v7 }
 0x6c2   : > { %v2434_v10 = vpop.f32.mrf.mxu1 }
 0x6dc   : > { %v1619_v13 = vpop.f32.mrf.mxu1 }
 0x6de   : > { %v2453_v2 = vpop.f32.mrf.mxu1 }
 0x6e0   : > { %v1622_v14 = vpop.f32.mrf.mxu1 }
 0x6e1   : > { %v1626_v15 = vpack.c.bf16 %v1622_v14, %v1619_v13 }
 0x6e2   : > { %v2454_v16 = vpop.f32.mrf.mxu1 }
 0x6e3   : > { %2456 = vmatpush3.bf16.msra.mxu0 %v1626_v15 }
 0x6e6   : > { %2458 = vmatmul.mubr.msk.bf16.vlgmr.msra.gmra.mxu0 %vm457_vm12, %v3140_v47 }
 0x7a6   : > { %v1661_v12 = vpop.f32.mrf.mxu0 }
 0x7a7   : > { %v1668_v18 = vmax.f32 %v1523_v5, %v1661_v12 }
 0x7a8   : > { %v2459_v20 = vpop.f32.mrf.mxu0 }
 0x7a9   : > { %v1670_v21 = vadd.f32 %v1668_v18, %v496_v17 }
 0x7aa   : > { %v1664_v22 = vpop.f32.mrf.mxu0 }
 0x7ab   : > { %v1672_v37 = vmax.f32 %v1670_v21, 0.0  ;;  %v1669_v39 = vmax.f32 %v1524_v9, %v1664_v22 }
 0x7ac   : > { %v2460_v47 = vpop.f32.mrf.mxu0 }
 0x7ad   : > { %1674 = vst [vmem:[%s302_s15] sm:$0xff] %v1672_v37  ;;  %v1671_v38 = vadd.f32 %v1669_v39, %v499_v26 }
 0x7af   : > { %v1673_v41 = vmax.f32 %v1671_v38, 0.0 }
 0x7b1   : > { %1675 = vst [vmem:[%s302_s15 + $0x8] sm:$0xff] %v1673_v41 }
 0x7b2   : > { %2652 = shalt.err (!%p2649_p4)
}
 0x7b3   : > { %s2653_s28 = scalar_lea.hbm %s3401_s23, 256  ;;  %s2657_s24 = scalar_lea.hbm %s3454_s5, 512 }
 0x7b4   : > { %p2654_p1 = scmp.ne.s32.totalorder %s3401_s23, %s2653_s28  ;;  %p2658_p10 = scmp.lt.s32.totalorder %s3401_s23, %s3454_s5 }
 0x7b5   : > { %p2659_p2 = scmp.lt.s32.totalorder %s2657_s24, %s2653_s28 }
 0x7b6   : > { %p2655_p9 = pnand %p2654_p1, %p3476_p3 }
 0x7b7   : > { %p2660_p12 = por %p2659_p2, %p2658_p10 }
 0x7b8   : > { %p2656_p11 = pneg %p2655_p9 }
 0x7ba   : > { %p2661_p8 = pnand %p2660_p12, %p2656_p11 }
 0x7bc   : > { %2664 = shalt.err (!%p2661_p8)
}
 0x7bd   : > { %s2738_s14 = smov 128   ;;  %s2739_s15 = smov 8  }
 0x7be   : > { %2471 = dma.vmem_to_hbm [thread:$0]  (%p3476_p3), %s3396_s9, 256, %s3401_s23, %s1677_s16, %s2738_s14, %s2738_s14, %s2739_s15  }
 0x7bf PF: > { %s3477_s13 = sld [smem:[#allocation12_spill]]  ;;  %s1706_s7 = sand.u32 1, %s2703_s18  }
 0x7c0   : > { %p3478_p6 = scmp.ne.s32.totalorder %s3468_s30, 0  ;;  %s1707_s11 = scalar_lea.sflag [#allocation4], %s1706_s7 }
 0x7c5   : > { %p3479_p0 = scmp.ge.s32.totalorder %s3477_s13, 2 }
 0x7c7   : > { %p2485_p5 = pnand %p3479_p0, %p3478_p6 }
 0x7c9   : > { %p2486_p7 = pneg %p2485_p5 }
 0x7cb   : > { %2698 = dma.done.wait (%p2486_p7), %s1707_s11, 256  }
 0x7cc   : > { %2700 = vsyncadd (%p2486_p7), %s1707_s11, 4294967040  ;;  %s22_s23 = sadd.s32 1, %s3477_s13   ;;  %s3480_s18 = smov %s2707_s19 }
 0x7cd   : > { %p19_p13 = scmp.ge.s32.totalorder %s22_s23, 4   ;;  %s3481_s19 = smov %s2711_s20 }
 0x7ce   : > { %s3482_s20 = smov %s2883_s12  ;;  %s3483_s21 = smov %s2719_s22 }
 0x7cf   : > { %s3484_s22 = smov %s3486_s8  ;;  %21 = sbr.rel (!%p19_p13) target bundleno = 10 (0xa), region = 96 }
 0x7d4   :  { %1712 = vsyncpa [#allocation3], 1 }
 0x7d5   :  { %1714 = vsyncpa [#allocation3 + $0x1], 1 }
 0x7d6   :  { %1715 = vsyncpa [#allocation6], 1 }
 0x7d7   :  { %1716 = vsyncpa [#allocation4], 1 }
 0x7d8   :  { %1718 = vsyncpa [#allocation4 + $0x1], 1 }

</bundles_post_ra>
